<compile_context>
chip_gen: v7x
topology: tpu7x:2x2x1
jax: 0.10.0
libtpu: 0.0.40
codegen_flags: <defaults>
</compile_context>

<pallas_src>
import functools

import numpy as np
import jax
import jax.numpy as jnp
from jax.experimental import pallas as pl
from jax.experimental.pallas import tpu as pltpu

LEAKY_SLOPE = 0.2
BN_EPS = 1e-5


def _leaky_relu(x):
    return jnp.where(x > 0, x, LEAKY_SLOPE * x)


def _softplus(x):
    # numerically-stable softplus (matches F.softplus within fp tolerance)
    return jnp.maximum(x, 0.0) + jnp.log(1.0 + jnp.exp(-jnp.abs(x)))


# --------------------------------------------------------------------------
# Single fused Encoder kernel
# refs = [x, (conv_w, bn_gamma, bn_beta) * depth,
#         w_fused_1x1_fc, b_fused_1x1_fc, w_head, b_head,   # inputs
#         out,                                              # output
#         xp_scratch]                                       # VMEM scratch
# --------------------------------------------------------------------------
def encoder_kernel(*refs, B, L, K, depth, reduced, softplus_eps, halo):
    n_in = 1 + 3 * depth + 4
    x_ref = refs[0]
    conv_refs = refs[1:1 + 3 * depth]
    w2_ref, b2_ref, wh_ref, bh_ref = refs[1 + 3 * depth:n_in]
    o_ref = refs[n_in]
    xp_ref = refs[n_in + 1]                      # (B, L + 2*halo, C) VMEM scratch

    pad = (K - 1) // 2
    M = B * L
    C = xp_ref.shape[-1]
    Rp = o_ref.shape[-1]
    base = halo - pad

    # Zero ONLY the halo rows once; park the (channel-padded) input interior.
    xp_ref[:, 0:halo, :] = jnp.zeros((B, halo, C), jnp.float32)
    xp_ref[:, L + halo:L + 2 * halo, :] = jnp.zeros((B, halo, C), jnp.float32)
    xp_ref[:, halo:halo + L, :] = x_ref[...]

    h = None
    for i in range(depth):
        w_ref, g_ref, be_ref = conv_refs[3 * i:3 * (i + 1)]

        xpv = xp_ref[...]                        # (B, L + 2*halo, C), halo rows are 0
        # Per-tap accumulation: K small (M,C)@(C,C) matmuls, no im2col buffer.
        # Conv bias omitted: it is exactly cancelled by the training-mode BN
        # mean subtraction below.
        acc = jnp.dot(xpv[:, base:base + L, :].reshape(M, C), w_ref[0],
                      preferred_element_type=jnp.float32)
        for k in range(1, K):
            acc = acc + jnp.dot(
                xpv[:, base + k:base + k + L, :].reshape(M, C), w_ref[k],
                preferred_element_type=jnp.float32)

        # BatchNorm1d (training batch stats, biased variance), single pass:
        # var = E[y^2] - mu^2, then fold affine into per-channel scale/shift.
        mu = jnp.mean(acc, axis=0, keepdims=True)
        m2 = jnp.mean(acc * acc, axis=0, keepdims=True)
        var = jnp.maximum(m2 - mu * mu, 0.0)
        scale = g_ref[...] * jax.lax.rsqrt(var + BN_EPS)
        shift = be_ref[...] - mu * scale
        y = _leaky_relu(acc * scale + shift)
        # TODO(synk): Dropout -> identity (eval mode); BN running stats skipped.

        if i < depth - 1:
            # keep the activation resident in the VMEM scratch for the next layer
            xp_ref[:, halo:halo + L, :] = y.reshape(B, L, C)
        else:
            h = y                                # (M, C)

    # Conv1d(1x1) + fc Linear folded host-side into one (C, C) matmul
    # (no nonlinearity between them); permute(0,2,1) is a no-op channels-last.
    h = _leaky_relu(jnp.dot(h, w2_ref[...],
                            preferred_element_type=jnp.float32) + b2_ref[...])
    # fc_mu / fc_logvar fused into one lane-dense (C, Rp) matmul; softplus on
    # the logvar lanes via a lane-index select, single unmasked packed store.
    y = jnp.dot(h, wh_ref[...], preferred_element_type=jnp.float32) + bh_ref[...]
    lane = jax.lax.broadcasted_iota(jnp.int32, y.shape, 1)
    packed = jnp.where(lane < reduced, y, _softplus(y) + softplus_eps)
    o_ref[...] = packed.reshape(B, L, Rp).astype(o_ref.dtype)


def encoder_forward(x_ncl, params, cfg):
    """x_ncl: (B, in_channels, L) — PyTorch layout. Returns (mu, std), each (B, L, reduced_size)."""
    B, Cin, L = x_ncl.shape
    C = cfg["channels"]
    K = cfg["kernel_size"]
    depth = cfg["depth"]
    R = cfg["reduced_size"]
    assert depth >= 1 and Cin <= C
    pad = (K - 1) // 2
    halo = max(8, ((pad + 7) // 8) * 8)              # tile-aligned interior offset
    Rp = ((2 * R + 127) // 128) * 128                # lane-dense packed head width

    x = jnp.transpose(x_ncl, (0, 2, 1)).astype(jnp.float32)   # (B, L, Cin)
    # Pad layer-0 input channels up to C (zero weight rows => identical math);
    # keeps every layer's per-tap matmul at the same lane-friendly width.
    if Cin < C:
        x = jnp.pad(x, ((0, 0), (0, 0), (0, C - Cin)))
        w0 = jnp.pad(params["conv_w_0"], ((0, 0), (0, C - Cin), (0, 0)))
    else:
        w0 = params["conv_w_0"]

    def full_spec(shape):
        nd = len(shape)
        return pl.BlockSpec(shape, lambda i, nd=nd: (0,) * nd)

    inputs = [x]
    in_specs = [full_spec((B, L, C))]
    for i in range(depth):
        w = w0 if i == 0 else params[f"conv_w_{i}"]           # (K, C, C)
        inputs += [w, params[f"bn_g_{i}"], params[f"bn_b_{i}"]]
        in_specs += [full_spec((K, C, C)), full_spec((1, C)), full_spec((1, C))]

    hp = jax.lax.Precision.HIGHEST
    # Fold conv1x1 -> fc (no nonlinearity in between) into ONE (C, C) matmul.
    w2 = jnp.dot(params["conv1x1_w"], params["fc_w"], precision=hp)           # (C, C)
    b2 = jnp.dot(params["conv1x1_b"], params["fc_w"], precision=hp) + params["fc_b"]
    # Fuse fc_mu / fc_logvar and pad to a lane-dense 128-multiple width.
    head_w = jnp.concatenate([params["fcmu_w"], params["fclv_w"]], axis=1)    # (C, 2R)
    head_b = jnp.concatenate([params["fcmu_b"], params["fclv_b"]], axis=1)    # (1, 2R)
    if Rp > 2 * R:
        head_w = jnp.pad(head_w, ((0, 0), (0, Rp - 2 * R)))
        head_b = jnp.pad(head_b, ((0, 0), (0, Rp - 2 * R)))
    inputs += [w2, b2, head_w, head_b]
    in_specs += [full_spec((C, C)), full_spec((1, C)),
                 full_spec((C, Rp)), full_spec((1, Rp))]

    # Explicit VMEM budget: double-buffered inputs/output + persistent scratch
    # + a handful of activation-sized temporaries, with headroom.
    in_bytes = sum(int(np.prod(a.shape)) * 4 for a in inputs)
    out_bytes = B * L * Rp * 4
    scratch_bytes = B * (L + 2 * halo) * C * 4
    tmp_bytes = 8 * B * L * C * 4 + 4 * B * L * Rp * 4
    budget = 2 * (in_bytes + out_bytes) + scratch_bytes + tmp_bytes + (4 << 20)
    vmem_limit = int(min(max(budget, 32 << 20), 96 << 20))

    kern = functools.partial(encoder_kernel, B=B, L=L, K=K, depth=depth,
                             reduced=R, softplus_eps=cfg["softplus_eps"], halo=halo)
    out = pl.pallas_call(
        kern,
        out_shape=jax.ShapeDtypeStruct((B, L, Rp), jnp.float32),
        grid=(1,),
        in_specs=in_specs,
        out_specs=pl.BlockSpec((B, L, Rp), lambda i: (0, 0, 0)),
        scratch_shapes=[pltpu.VMEM((B, L + 2 * halo, C), jnp.float32)],
        compiler_params=pltpu.CompilerParams(
            dimension_semantics=("arbitrary",),
            vmem_limit_bytes=vmem_limit),
    )(*inputs)
    return out[..., :R], out[..., R:2 * R]


# --------------------------------------------------------------------------
# Pure-JAX reference (independent formulation: jnp.pad + per-tap einsum,
# faithful to the PyTorch module incl. conv bias and two-pass BN stats)
# --------------------------------------------------------------------------
def encoder_ref(x_ncl, params, cfg):
    B, Cin, L = x_ncl.shape
    C, K = cfg["channels"], cfg["kernel_size"]
    depth, R = cfg["depth"], cfg["reduced_size"]
    pad = (K - 1) // 2
    x = jnp.transpose(x_ncl, (0, 2, 1)).astype(jnp.float32)   # (B, L, Cin)
    for i in range(depth):
        w = params[f"conv_w_{i}"]                              # (K, Cin_i, C)
        xp = jnp.pad(x, ((0, 0), (pad, pad), (0, 0)))
        acc = jnp.zeros((B, L, C), jnp.float32)
        for k in range(K):
            acc = acc + jnp.einsum("blc,cd->bld", xp[:, k:k + L, :], w[k])
        acc = acc + params[f"conv_b_{i}"]
        y = acc.reshape(B * L, C)
        mu = jnp.mean(y, axis=0, keepdims=True)
        var = jnp.mean((y - mu) ** 2, axis=0, keepdims=True)
        y = (y - mu) * jax.lax.rsqrt(var + BN_EPS)
        y = _leaky_relu(y * params[f"bn_g_{i}"] + params[f"bn_b_{i}"])
        x = y.reshape(B, L, C)
    h = x.reshape(B * L, C) @ params["conv1x1_w"] + params["conv1x1_b"]
    h = _leaky_relu(h @ params["fc_w"] + params["fc_b"])
    mu_out = h @ params["fcmu_w"] + params["fcmu_b"]
    lv = h @ params["fclv_w"] + params["fclv_b"]
    std = _softplus(lv) + cfg["softplus_eps"]
    return mu_out.reshape(B, L, R), std.reshape(B, L, R)


if __name__ == "__main__":
    cfg = dict(in_channels=8, channels=64, depth=3, reduced_size=32,
               out_channels=16, kernel_size=5, softplus_eps=1e-4)
    B, L = 2, 16

    key = jax.random.PRNGKey(0)
    keys = iter(jax.random.split(key, 64))

    params = {}
    cur = cfg["in_channels"]
    for i in range(cfg["depth"]):
        params[f"conv_w_{i}"] = 0.05 * jax.random.normal(
            next(keys), (cfg["kernel_size"], cur, cfg["channels"]), jnp.float32)
        params[f"conv_b_{i}"] = 0.05 * jax.random.normal(next(keys), (1, cfg["channels"]), jnp.float32)
        params[f"bn_g_{i}"] = 1.0 + 0.1 * jax.random.normal(next(keys), (1, cfg["channels"]), jnp.float32)
        params[f"bn_b_{i}"] = 0.1 * jax.random.normal(next(keys), (1, cfg["channels"]), jnp.float32)
        cur = cfg["channels"]
    params["conv1x1_w"] = 0.1 * jax.random.normal(next(keys), (cfg["channels"], cfg["out_channels"]), jnp.float32)
    params["conv1x1_b"] = 0.1 * jax.random.normal(next(keys), (1, cfg["out_channels"]), jnp.float32)
    params["fc_w"] = 0.1 * jax.random.normal(next(keys), (cfg["out_channels"], cfg["channels"]), jnp.float32)
    params["fc_b"] = 0.1 * jax.random.normal(next(keys), (1, cfg["channels"]), jnp.float32)
    params["fcmu_w"] = 0.1 * jax.random.normal(next(keys), (cfg["channels"], cfg["reduced_size"]), jnp.float32)
    params["fcmu_b"] = 0.1 * jax.random.normal(next(keys), (1, cfg["reduced_size"]), jnp.float32)
    params["fclv_w"] = 0.1 * jax.random.normal(next(keys), (cfg["channels"], cfg["reduced_size"]), jnp.float32)
    params["fclv_b"] = 0.1 * jax.random.normal(next(keys), (1, cfg["reduced_size"]), jnp.float32)

    # PyTorch-layout input (B, in_channels, L)
    x = jax.random.normal(next(keys), (B, cfg["in_channels"], L), jnp.float32)

    mu, std = encoder_forward(x, params, cfg)
    jax.block_until_ready((mu, std))

    mu_ref, std_ref = encoder_ref(x, params, cfg)
    np.testing.assert_allclose(np.asarray(mu), np.asarray(mu_ref), rtol=1e-4, atol=1e-4)
    np.testing.assert_allclose(np.asarray(std), np.asarray(std_ref), rtol=1e-4, atol=1e-4)
    assert mu.shape == (B, L, cfg["reduced_size"]) and std.shape == (B, L, cfg["reduced_size"])
    assert bool(jnp.all(std > 0))

    print("KERNEL_OK")
</pallas_src>

<mosaic_0001>
module attributes {stable_mosaic.version = 11 : i64} {
  func.func @encoder_kernel(%arg0: i32, %arg1: memref<2x16x64xf32, #tpu.memory_space<vmem>>, %arg2: memref<5x64x64xf32, #tpu.memory_space<vmem>>, %arg3: memref<1x64xf32, #tpu.memory_space<vmem>>, %arg4: memref<1x64xf32, #tpu.memory_space<vmem>>, %arg5: memref<5x64x64xf32, #tpu.memory_space<vmem>>, %arg6: memref<1x64xf32, #tpu.memory_space<vmem>>, %arg7: memref<1x64xf32, #tpu.memory_space<vmem>>, %arg8: memref<5x64x64xf32, #tpu.memory_space<vmem>>, %arg9: memref<1x64xf32, #tpu.memory_space<vmem>>, %arg10: memref<1x64xf32, #tpu.memory_space<vmem>>, %arg11: memref<64x64xf32, #tpu.memory_space<vmem>>, %arg12: memref<1x64xf32, #tpu.memory_space<vmem>>, %arg13: memref<64x128xf32, #tpu.memory_space<vmem>>, %arg14: memref<1x128xf32, #tpu.memory_space<vmem>>, %arg15: memref<2x16x128xf32, #tpu.memory_space<vmem>>, %arg16: memref<2x32x64xf32, #tpu.memory_space<vmem>>) attributes {dimension_semantics = [#tpu.dimension_semantics<arbitrary>], iteration_bounds = array<i64: 1>, scalar_prefetch = 0 : i64, scratch_operands = 1 : i64, tpu.core_type = #tpu.core_type<tc>, window_params = [{pipeline_mode = #tpu.pipeline_mode<synchronous>, transform_indices = @transform_0, window_bounds = array<i64: 2, 16, 64>}, {pipeline_mode = #tpu.pipeline_mode<synchronous>, transform_indices = @transform_1, window_bounds = array<i64: 5, 64, 64>}, {pipeline_mode = #tpu.pipeline_mode<synchronous>, transform_indices = @transform_2, window_bounds = array<i64: 1, 64>}, {pipeline_mode = #tpu.pipeline_mode<synchronous>, transform_indices = @transform_3, window_bounds = array<i64: 1, 64>}, {pipeline_mode = #tpu.pipeline_mode<synchronous>, transform_indices = @transform_4, window_bounds = array<i64: 5, 64, 64>}, {pipeline_mode = #tpu.pipeline_mode<synchronous>, transform_indices = @transform_5, window_bounds = array<i64: 1, 64>}, {pipeline_mode = #tpu.pipeline_mode<synchronous>, transform_indices = @transform_6, window_bounds = array<i64: 1, 64>}, {pipeline_mode = #tpu.pipeline_mode<synchronous>, transform_indices = @transform_7, window_bounds = array<i64: 5, 64, 64>}, {pipeline_mode = #tpu.pipeline_mode<synchronous>, transform_indices = @transform_8, window_bounds = array<i64: 1, 64>}, {pipeline_mode = #tpu.pipeline_mode<synchronous>, transform_indices = @transform_9, window_bounds = array<i64: 1, 64>}, {pipeline_mode = #tpu.pipeline_mode<synchronous>, transform_indices = @transform_10, window_bounds = array<i64: 64, 64>}, {pipeline_mode = #tpu.pipeline_mode<synchronous>, transform_indices = @transform_11, window_bounds = array<i64: 1, 64>}, {pipeline_mode = #tpu.pipeline_mode<synchronous>, transform_indices = @transform_12, window_bounds = array<i64: 64, 128>}, {pipeline_mode = #tpu.pipeline_mode<synchronous>, transform_indices = @transform_13, window_bounds = array<i64: 1, 128>}, {pipeline_mode = #tpu.pipeline_mode<synchronous>, transform_indices = @transform_14, window_bounds = array<i64: 2, 16, 128>}]} {
    %cst = arith.constant 0.000000e+00 : f32
    %0 = vector.broadcast %cst : f32 to vector<2x8x64xf32>
    %c0 = arith.constant 0 : index
    %c0_0 = arith.constant 0 : index
    %c0_1 = arith.constant 0 : index
    %1 = vector.load %arg16[%c0, %c0_0, %c0_1] : memref<2x32x64xf32, #tpu.memory_space<vmem>>, vector<2x8x64xf32>
    tpu.vector_store %arg16[%c0, %c0_0, %c0_1], %0 {strides = array<i32>} : memref<2x32x64xf32, #tpu.memory_space<vmem>>, vector<2x8x64xf32>,
    %cst_2 = arith.constant 0.000000e+00 : f32
    %2 = vector.broadcast %cst_2 : f32 to vector<2x8x64xf32>
    %c0_3 = arith.constant 0 : index
    %c24 = arith.constant 24 : index
    %c0_4 = arith.constant 0 : index
    %3 = vector.load %arg16[%c0_3, %c24, %c0_4] : memref<2x32x64xf32, #tpu.memory_space<vmem>>, vector<2x8x64xf32>
    tpu.vector_store %arg16[%c0_3, %c24, %c0_4], %2 {strides = array<i32>} : memref<2x32x64xf32, #tpu.memory_space<vmem>>, vector<2x8x64xf32>,
    %c0_5 = arith.constant 0 : index
    %c0_6 = arith.constant 0 : index
    %c0_7 = arith.constant 0 : index
    %4 = vector.load %arg1[%c0_5, %c0_6, %c0_7] : memref<2x16x64xf32, #tpu.memory_space<vmem>>, vector<2x16x64xf32>
    %c0_8 = arith.constant 0 : index
    %c8 = arith.constant 8 : index
    %c0_9 = arith.constant 0 : index
    %5 = vector.load %arg16[%c0_8, %c8, %c0_9] : memref<2x32x64xf32, #tpu.memory_space<vmem>>, vector<2x16x64xf32>
    tpu.vector_store %arg16[%c0_8, %c8, %c0_9], %4 {strides = array<i32>} : memref<2x32x64xf32, #tpu.memory_space<vmem>>, vector<2x16x64xf32>,
    %c0_10 = arith.constant 0 : index
    %c0_11 = arith.constant 0 : index
    %c0_12 = arith.constant 0 : index
    %6 = vector.load %arg16[%c0_10, %c0_11, %c0_12] : memref<2x32x64xf32, #tpu.memory_space<vmem>>, vector<2x32x64xf32>
    %7 = vector.extract_strided_slice %6 {offsets = [0, 6, 0], sizes = [2, 16, 64], strides = [1, 1, 1]} : vector<2x32x64xf32> to vector<2x16x64xf32>
    %8 = vector.shape_cast %7 : vector<2x16x64xf32> to vector<32x64xf32>
    %c0_13 = arith.constant 0 : index
    %c0_14 = arith.constant 0 : index
    %c0_15 = arith.constant 0 : index
    %9 = vector.load %arg2[%c0_13, %c0_14, %c0_15] : memref<5x64x64xf32, #tpu.memory_space<vmem>>, vector<1x64x64xf32>
    %10 = vector.shape_cast %9 : vector<1x64x64xf32> to vector<64x64xf32>
    %cst_16 = arith.constant dense<0.000000e+00> : vector<32x64xf32>
    %11 = tpu.matmul %8, %10, %cst_16 {dimension_numbers = #tpu.dot_dimension_numbers<[1], [0], [0], [1], [0, 0, 1, 1], [], []>} : vector<32x64xf32>, vector<64x64xf32>, vector<32x64xf32> -> vector<32x64xf32>
    %12 = vector.extract_strided_slice %6 {offsets = [0, 7, 0], sizes = [2, 16, 64], strides = [1, 1, 1]} : vector<2x32x64xf32> to vector<2x16x64xf32>
    %13 = vector.shape_cast %12 : vector<2x16x64xf32> to vector<32x64xf32>
    %c1 = arith.constant 1 : index
    %c0_17 = arith.constant 0 : index
    %c0_18 = arith.constant 0 : index
    %14 = vector.load %arg2[%c1, %c0_17, %c0_18] : memref<5x64x64xf32, #tpu.memory_space<vmem>>, vector<1x64x64xf32>
    %15 = vector.shape_cast %14 : vector<1x64x64xf32> to vector<64x64xf32>
    %cst_19 = arith.constant dense<0.000000e+00> : vector<32x64xf32>
    %16 = tpu.matmul %13, %15, %cst_19 {dimension_numbers = #tpu.dot_dimension_numbers<[1], [0], [0], [1], [0, 0, 1, 1], [], []>} : vector<32x64xf32>, vector<64x64xf32>, vector<32x64xf32> -> vector<32x64xf32>
    %17 = arith.addf %11, %16 : vector<32x64xf32>
    %18 = vector.extract_strided_slice %6 {offsets = [0, 8, 0], sizes = [2, 16, 64], strides = [1, 1, 1]} : vector<2x32x64xf32> to vector<2x16x64xf32>
    %19 = vector.shape_cast %18 : vector<2x16x64xf32> to vector<32x64xf32>
    %c2 = arith.constant 2 : index
    %c0_20 = arith.constant 0 : index
    %c0_21 = arith.constant 0 : index
    %20 = vector.load %arg2[%c2, %c0_20, %c0_21] : memref<5x64x64xf32, #tpu.memory_space<vmem>>, vector<1x64x64xf32>
    %21 = vector.shape_cast %20 : vector<1x64x64xf32> to vector<64x64xf32>
    %cst_22 = arith.constant dense<0.000000e+00> : vector<32x64xf32>
    %22 = tpu.matmul %19, %21, %cst_22 {dimension_numbers = #tpu.dot_dimension_numbers<[1], [0], [0], [1], [0, 0, 1, 1], [], []>} : vector<32x64xf32>, vector<64x64xf32>, vector<32x64xf32> -> vector<32x64xf32>
    %23 = arith.addf %17, %22 : vector<32x64xf32>
    %24 = vector.extract_strided_slice %6 {offsets = [0, 9, 0], sizes = [2, 16, 64], strides = [1, 1, 1]} : vector<2x32x64xf32> to vector<2x16x64xf32>
    %25 = vector.shape_cast %24 : vector<2x16x64xf32> to vector<32x64xf32>
    %c3 = arith.constant 3 : index
    %c0_23 = arith.constant 0 : index
    %c0_24 = arith.constant 0 : index
    %26 = vector.load %arg2[%c3, %c0_23, %c0_24] : memref<5x64x64xf32, #tpu.memory_space<vmem>>, vector<1x64x64xf32>
    %27 = vector.shape_cast %26 : vector<1x64x64xf32> to vector<64x64xf32>
    %cst_25 = arith.constant dense<0.000000e+00> : vector<32x64xf32>
    %28 = tpu.matmul %25, %27, %cst_25 {dimension_numbers = #tpu.dot_dimension_numbers<[1], [0], [0], [1], [0, 0, 1, 1], [], []>} : vector<32x64xf32>, vector<64x64xf32>, vector<32x64xf32> -> vector<32x64xf32>
    %29 = arith.addf %23, %28 : vector<32x64xf32>
    %30 = vector.extract_strided_slice %6 {offsets = [0, 10, 0], sizes = [2, 16, 64], strides = [1, 1, 1]} : vector<2x32x64xf32> to vector<2x16x64xf32>
    %31 = vector.shape_cast %30 : vector<2x16x64xf32> to vector<32x64xf32>
    %c4 = arith.constant 4 : index
    %c0_26 = arith.constant 0 : index
    %c0_27 = arith.constant 0 : index
    %32 = vector.load %arg2[%c4, %c0_26, %c0_27] : memref<5x64x64xf32, #tpu.memory_space<vmem>>, vector<1x64x64xf32>
    %33 = vector.shape_cast %32 : vector<1x64x64xf32> to vector<64x64xf32>
    %cst_28 = arith.constant dense<0.000000e+00> : vector<32x64xf32>
    %34 = tpu.matmul %31, %33, %cst_28 {dimension_numbers = #tpu.dot_dimension_numbers<[1], [0], [0], [1], [0, 0, 1, 1], [], []>} : vector<32x64xf32>, vector<64x64xf32>, vector<32x64xf32> -> vector<32x64xf32>
    %35 = arith.addf %29, %34 : vector<32x64xf32>
    %cst_29 = arith.constant dense<0.000000e+00> : vector<64xf32>
    %36 = vector.multi_reduction <add>, %35, %cst_29 [0] : vector<32x64xf32> to vector<64xf32>
    %37 = vector.shape_cast %36 : vector<64xf32> to vector<1x64xf32>
    %cst_30 = arith.constant 3.200000e+01 : f32
    %38 = vector.broadcast %cst_30 : f32 to vector<1x64xf32>
    %39 = arith.divf %37, %38 : vector<1x64xf32>
    %40 = arith.mulf %35, %35 : vector<32x64xf32>
    %cst_31 = arith.constant dense<0.000000e+00> : vector<64xf32>
    %41 = vector.multi_reduction <add>, %40, %cst_31 [0] : vector<32x64xf32> to vector<64xf32>
    %42 = vector.shape_cast %41 : vector<64xf32> to vector<1x64xf32>
    %cst_32 = arith.constant 3.200000e+01 : f32
    %43 = vector.broadcast %cst_32 : f32 to vector<1x64xf32>
    %44 = arith.divf %42, %43 : vector<1x64xf32>
    %45 = arith.mulf %39, %39 : vector<1x64xf32>
    %46 = arith.subf %44, %45 : vector<1x64xf32>
    %cst_33 = arith.constant 0.000000e+00 : f32
    %47 = vector.broadcast %cst_33 : f32 to vector<1x64xf32>
    %48 = arith.maximumf %46, %47 : vector<1x64xf32>
    %c0_34 = arith.constant 0 : index
    %c0_35 = arith.constant 0 : index
    %49 = vector.load %arg3[%c0_34, %c0_35] : memref<1x64xf32, #tpu.memory_space<vmem>>, vector<1x64xf32>
    %cst_36 = arith.constant 9.99999974E-6 : f32
    %50 = vector.broadcast %cst_36 : f32 to vector<1x64xf32>
    %51 = arith.addf %48, %50 : vector<1x64xf32>
    %52 = math.rsqrt %51 : vector<1x64xf32>
    %53 = arith.mulf %49, %52 : vector<1x64xf32>
    %c0_37 = arith.constant 0 : index
    %c0_38 = arith.constant 0 : index
    %54 = vector.load %arg4[%c0_37, %c0_38] : memref<1x64xf32, #tpu.memory_space<vmem>>, vector<1x64xf32>
    %55 = arith.mulf %39, %53 : vector<1x64xf32>
    %56 = arith.subf %54, %55 : vector<1x64xf32>
    %57 = vector.broadcast %53 : vector<1x64xf32> to vector<32x64xf32>
    %58 = arith.mulf %35, %57 : vector<32x64xf32>
    %59 = vector.broadcast %56 : vector<1x64xf32> to vector<32x64xf32>
    %60 = arith.addf %58, %59 : vector<32x64xf32>
    %cst_39 = arith.constant 0.000000e+00 : f32
    %61 = vector.broadcast %cst_39 : f32 to vector<32x64xf32>
    %62 = arith.cmpf ogt, %60, %61 : vector<32x64xf32>
    %cst_40 = arith.constant 2.000000e-01 : f32
    %63 = vector.broadcast %cst_40 : f32 to vector<32x64xf32>
    %64 = arith.mulf %63, %60 : vector<32x64xf32>
    %65 = arith.select %62, %60, %64 : vector<32x64xi1>, vector<32x64xf32>
    %66 = vector.shape_cast %65 : vector<32x64xf32> to vector<2x16x64xf32>
    %c0_41 = arith.constant 0 : index
    %c8_42 = arith.constant 8 : index
    %c0_43 = arith.constant 0 : index
    %67 = vector.load %arg16[%c0_41, %c8_42, %c0_43] : memref<2x32x64xf32, #tpu.memory_space<vmem>>, vector<2x16x64xf32>
    tpu.vector_store %arg16[%c0_41, %c8_42, %c0_43], %66 {strides = array<i32>} : memref<2x32x64xf32, #tpu.memory_space<vmem>>, vector<2x16x64xf32>,
    %c0_44 = arith.constant 0 : index
    %c0_45 = arith.constant 0 : index
    %c0_46 = arith.constant 0 : index
    %68 = vector.load %arg16[%c0_44, %c0_45, %c0_46] : memref<2x32x64xf32, #tpu.memory_space<vmem>>, vector<2x32x64xf32>
    %69 = vector.extract_strided_slice %68 {offsets = [0, 6, 0], sizes = [2, 16, 64], strides = [1, 1, 1]} : vector<2x32x64xf32> to vector<2x16x64xf32>
    %70 = vector.shape_cast %69 : vector<2x16x64xf32> to vector<32x64xf32>
    %c0_47 = arith.constant 0 : index
    %c0_48 = arith.constant 0 : index
    %c0_49 = arith.constant 0 : index
    %71 = vector.load %arg5[%c0_47, %c0_48, %c0_49] : memref<5x64x64xf32, #tpu.memory_space<vmem>>, vector<1x64x64xf32>
    %72 = vector.shape_cast %71 : vector<1x64x64xf32> to vector<64x64xf32>
    %cst_50 = arith.constant dense<0.000000e+00> : vector<32x64xf32>
    %73 = tpu.matmul %70, %72, %cst_50 {dimension_numbers = #tpu.dot_dimension_numbers<[1], [0], [0], [1], [0, 0, 1, 1], [], []>} : vector<32x64xf32>, vector<64x64xf32>, vector<32x64xf32> -> vector<32x64xf32>
    %74 = vector.extract_strided_slice %68 {offsets = [0, 7, 0], sizes = [2, 16, 64], strides = [1, 1, 1]} : vector<2x32x64xf32> to vector<2x16x64xf32>
    %75 = vector.shape_cast %74 : vector<2x16x64xf32> to vector<32x64xf32>
    %c1_51 = arith.constant 1 : index
    %c0_52 = arith.constant 0 : index
    %c0_53 = arith.constant 0 : index
    %76 = vector.load %arg5[%c1_51, %c0_52, %c0_53] : memref<5x64x64xf32, #tpu.memory_space<vmem>>, vector<1x64x64xf32>
    %77 = vector.shape_cast %76 : vector<1x64x64xf32> to vector<64x64xf32>
    %cst_54 = arith.constant dense<0.000000e+00> : vector<32x64xf32>
    %78 = tpu.matmul %75, %77, %cst_54 {dimension_numbers = #tpu.dot_dimension_numbers<[1], [0], [0], [1], [0, 0, 1, 1], [], []>} : vector<32x64xf32>, vector<64x64xf32>, vector<32x64xf32> -> vector<32x64xf32>
    %79 = arith.addf %73, %78 : vector<32x64xf32>
    %80 = vector.extract_strided_slice %68 {offsets = [0, 8, 0], sizes = [2, 16, 64], strides = [1, 1, 1]} : vector<2x32x64xf32> to vector<2x16x64xf32>
    %81 = vector.shape_cast %80 : vector<2x16x64xf32> to vector<32x64xf32>
    %c2_55 = arith.constant 2 : index
    %c0_56 = arith.constant 0 : index
    %c0_57 = arith.constant 0 : index
    %82 = vector.load %arg5[%c2_55, %c0_56, %c0_57] : memref<5x64x64xf32, #tpu.memory_space<vmem>>, vector<1x64x64xf32>
    %83 = vector.shape_cast %82 : vector<1x64x64xf32> to vector<64x64xf32>
    %cst_58 = arith.constant dense<0.000000e+00> : vector<32x64xf32>
    %84 = tpu.matmul %81, %83, %cst_58 {dimension_numbers = #tpu.dot_dimension_numbers<[1], [0], [0], [1], [0, 0, 1, 1], [], []>} : vector<32x64xf32>, vector<64x64xf32>, vector<32x64xf32> -> vector<32x64xf32>
    %85 = arith.addf %79, %84 : vector<32x64xf32>
    %86 = vector.extract_strided_slice %68 {offsets = [0, 9, 0], sizes = [2, 16, 64], strides = [1, 1, 1]} : vector<2x32x64xf32> to vector<2x16x64xf32>
    %87 = vector.shape_cast %86 : vector<2x16x64xf32> to vector<32x64xf32>
    %c3_59 = arith.constant 3 : index
    %c0_60 = arith.constant 0 : index
    %c0_61 = arith.constant 0 : index
    %88 = vector.load %arg5[%c3_59, %c0_60, %c0_61] : memref<5x64x64xf32, #tpu.memory_space<vmem>>, vector<1x64x64xf32>
    %89 = vector.shape_cast %88 : vector<1x64x64xf32> to vector<64x64xf32>
    %cst_62 = arith.constant dense<0.000000e+00> : vector<32x64xf32>
    %90 = tpu.matmul %87, %89, %cst_62 {dimension_numbers = #tpu.dot_dimension_numbers<[1], [0], [0], [1], [0, 0, 1, 1], [], []>} : vector<32x64xf32>, vector<64x64xf32>, vector<32x64xf32> -> vector<32x64xf32>
    %91 = arith.addf %85, %90 : vector<32x64xf32>
    %92 = vector.extract_strided_slice %68 {offsets = [0, 10, 0], sizes = [2, 16, 64], strides = [1, 1, 1]} : vector<2x32x64xf32> to vector<2x16x64xf32>
    %93 = vector.shape_cast %92 : vector<2x16x64xf32> to vector<32x64xf32>
    %c4_63 = arith.constant 4 : index
    %c0_64 = arith.constant 0 : index
    %c0_65 = arith.constant 0 : index
    %94 = vector.load %arg5[%c4_63, %c0_64, %c0_65] : memref<5x64x64xf32, #tpu.memory_space<vmem>>, vector<1x64x64xf32>
    %95 = vector.shape_cast %94 : vector<1x64x64xf32> to vector<64x64xf32>
    %cst_66 = arith.constant dense<0.000000e+00> : vector<32x64xf32>
    %96 = tpu.matmul %93, %95, %cst_66 {dimension_numbers = #tpu.dot_dimension_numbers<[1], [0], [0], [1], [0, 0, 1, 1], [], []>} : vector<32x64xf32>, vector<64x64xf32>, vector<32x64xf32> -> vector<32x64xf32>
    %97 = arith.addf %91, %96 : vector<32x64xf32>
    %cst_67 = arith.constant dense<0.000000e+00> : vector<64xf32>
    %98 = vector.multi_reduction <add>, %97, %cst_67 [0] : vector<32x64xf32> to vector<64xf32>
    %99 = vector.shape_cast %98 : vector<64xf32> to vector<1x64xf32>
    %cst_68 = arith.constant 3.200000e+01 : f32
    %100 = vector.broadcast %cst_68 : f32 to vector<1x64xf32>
    %101 = arith.divf %99, %100 : vector<1x64xf32>
    %102 = arith.mulf %97, %97 : vector<32x64xf32>
    %cst_69 = arith.constant dense<0.000000e+00> : vector<64xf32>
    %103 = vector.multi_reduction <add>, %102, %cst_69 [0] : vector<32x64xf32> to vector<64xf32>
    %104 = vector.shape_cast %103 : vector<64xf32> to vector<1x64xf32>
    %cst_70 = arith.constant 3.200000e+01 : f32
    %105 = vector.broadcast %cst_70 : f32 to vector<1x64xf32>
    %106 = arith.divf %104, %105 : vector<1x64xf32>
    %107 = arith.mulf %101, %101 : vector<1x64xf32>
    %108 = arith.subf %106, %107 : vector<1x64xf32>
    %cst_71 = arith.constant 0.000000e+00 : f32
    %109 = vector.broadcast %cst_71 : f32 to vector<1x64xf32>
    %110 = arith.maximumf %108, %109 : vector<1x64xf32>
    %c0_72 = arith.constant 0 : index
    %c0_73 = arith.constant 0 : index
    %111 = vector.load %arg6[%c0_72, %c0_73] : memref<1x64xf32, #tpu.memory_space<vmem>>, vector<1x64xf32>
    %cst_74 = arith.constant 9.99999974E-6 : f32
    %112 = vector.broadcast %cst_74 : f32 to vector<1x64xf32>
    %113 = arith.addf %110, %112 : vector<1x64xf32>
    %114 = math.rsqrt %113 : vector<1x64xf32>
    %115 = arith.mulf %111, %114 : vector<1x64xf32>
    %c0_75 = arith.constant 0 : index
    %c0_76 = arith.constant 0 : index
    %116 = vector.load %arg7[%c0_75, %c0_76] : memref<1x64xf32, #tpu.memory_space<vmem>>, vector<1x64xf32>
    %117 = arith.mulf %101, %115 : vector<1x64xf32>
    %118 = arith.subf %116, %117 : vector<1x64xf32>
    %119 = vector.broadcast %115 : vector<1x64xf32> to vector<32x64xf32>
    %120 = arith.mulf %97, %119 : vector<32x64xf32>
    %121 = vector.broadcast %118 : vector<1x64xf32> to vector<32x64xf32>
    %122 = arith.addf %120, %121 : vector<32x64xf32>
    %cst_77 = arith.constant 0.000000e+00 : f32
    %123 = vector.broadcast %cst_77 : f32 to vector<32x64xf32>
    %124 = arith.cmpf ogt, %122, %123 : vector<32x64xf32>
    %cst_78 = arith.constant 2.000000e-01 : f32
    %125 = vector.broadcast %cst_78 : f32 to vector<32x64xf32>
    %126 = arith.mulf %125, %122 : vector<32x64xf32>
    %127 = arith.select %124, %122, %126 : vector<32x64xi1>, vector<32x64xf32>
    %128 = vector.shape_cast %127 : vector<32x64xf32> to vector<2x16x64xf32>
    %c0_79 = arith.constant 0 : index
    %c8_80 = arith.constant 8 : index
    %c0_81 = arith.constant 0 : index
    %129 = vector.load %arg16[%c0_79, %c8_80, %c0_81] : memref<2x32x64xf32, #tpu.memory_space<vmem>>, vector<2x16x64xf32>
    tpu.vector_store %arg16[%c0_79, %c8_80, %c0_81], %128 {strides = array<i32>} : memref<2x32x64xf32, #tpu.memory_space<vmem>>, vector<2x16x64xf32>,
    %c0_82 = arith.constant 0 : index
    %c0_83 = arith.constant 0 : index
    %c0_84 = arith.constant 0 : index
    %130 = vector.load %arg16[%c0_82, %c0_83, %c0_84] : memref<2x32x64xf32, #tpu.memory_space<vmem>>, vector<2x32x64xf32>
    %131 = vector.extract_strided_slice %130 {offsets = [0, 6, 0], sizes = [2, 16, 64], strides = [1, 1, 1]} : vector<2x32x64xf32> to vector<2x16x64xf32>
    %132 = vector.shape_cast %131 : vector<2x16x64xf32> to vector<32x64xf32>
    %c0_85 = arith.constant 0 : index
    %c0_86 = arith.constant 0 : index
    %c0_87 = arith.constant 0 : index
    %133 = vector.load %arg8[%c0_85, %c0_86, %c0_87] : memref<5x64x64xf32, #tpu.memory_space<vmem>>, vector<1x64x64xf32>
    %134 = vector.shape_cast %133 : vector<1x64x64xf32> to vector<64x64xf32>
    %cst_88 = arith.constant dense<0.000000e+00> : vector<32x64xf32>
    %135 = tpu.matmul %132, %134, %cst_88 {dimension_numbers = #tpu.dot_dimension_numbers<[1], [0], [0], [1], [0, 0, 1, 1], [], []>} : vector<32x64xf32>, vector<64x64xf32>, vector<32x64xf32> -> vector<32x64xf32>
    %136 = vector.extract_strided_slice %130 {offsets = [0, 7, 0], sizes = [2, 16, 64], strides = [1, 1, 1]} : vector<2x32x64xf32> to vector<2x16x64xf32>
    %137 = vector.shape_cast %136 : vector<2x16x64xf32> to vector<32x64xf32>
    %c1_89 = arith.constant 1 : index
    %c0_90 = arith.constant 0 : index
    %c0_91 = arith.constant 0 : index
    %138 = vector.load %arg8[%c1_89, %c0_90, %c0_91] : memref<5x64x64xf32, #tpu.memory_space<vmem>>, vector<1x64x64xf32>
    %139 = vector.shape_cast %138 : vector<1x64x64xf32> to vector<64x64xf32>
    %cst_92 = arith.constant dense<0.000000e+00> : vector<32x64xf32>
    %140 = tpu.matmul %137, %139, %cst_92 {dimension_numbers = #tpu.dot_dimension_numbers<[1], [0], [0], [1], [0, 0, 1, 1], [], []>} : vector<32x64xf32>, vector<64x64xf32>, vector<32x64xf32> -> vector<32x64xf32>
    %141 = arith.addf %135, %140 : vector<32x64xf32>
    %142 = vector.extract_strided_slice %130 {offsets = [0, 8, 0], sizes = [2, 16, 64], strides = [1, 1, 1]} : vector<2x32x64xf32> to vector<2x16x64xf32>
    %143 = vector.shape_cast %142 : vector<2x16x64xf32> to vector<32x64xf32>
    %c2_93 = arith.constant 2 : index
    %c0_94 = arith.constant 0 : index
    %c0_95 = arith.constant 0 : index
    %144 = vector.load %arg8[%c2_93, %c0_94, %c0_95] : memref<5x64x64xf32, #tpu.memory_space<vmem>>, vector<1x64x64xf32>
    %145 = vector.shape_cast %144 : vector<1x64x64xf32> to vector<64x64xf32>
    %cst_96 = arith.constant dense<0.000000e+00> : vector<32x64xf32>
    %146 = tpu.matmul %143, %145, %cst_96 {dimension_numbers = #tpu.dot_dimension_numbers<[1], [0], [0], [1], [0, 0, 1, 1], [], []>} : vector<32x64xf32>, vector<64x64xf32>, vector<32x64xf32> -> vector<32x64xf32>
    %147 = arith.addf %141, %146 : vector<32x64xf32>
    %148 = vector.extract_strided_slice %130 {offsets = [0, 9, 0], sizes = [2, 16, 64], strides = [1, 1, 1]} : vector<2x32x64xf32> to vector<2x16x64xf32>
    %149 = vector.shape_cast %148 : vector<2x16x64xf32> to vector<32x64xf32>
    %c3_97 = arith.constant 3 : index
    %c0_98 = arith.constant 0 : index
    %c0_99 = arith.constant 0 : index
    %150 = vector.load %arg8[%c3_97, %c0_98, %c0_99] : memref<5x64x64xf32, #tpu.memory_space<vmem>>, vector<1x64x64xf32>
    %151 = vector.shape_cast %150 : vector<1x64x64xf32> to vector<64x64xf32>
    %cst_100 = arith.constant dense<0.000000e+00> : vector<32x64xf32>
    %152 = tpu.matmul %149, %151, %cst_100 {dimension_numbers = #tpu.dot_dimension_numbers<[1], [0], [0], [1], [0, 0, 1, 1], [], []>} : vector<32x64xf32>, vector<64x64xf32>, vector<32x64xf32> -> vector<32x64xf32>
    %153 = arith.addf %147, %152 : vector<32x64xf32>
    %154 = vector.extract_strided_slice %130 {offsets = [0, 10, 0], sizes = [2, 16, 64], strides = [1, 1, 1]} : vector<2x32x64xf32> to vector<2x16x64xf32>
    %155 = vector.shape_cast %154 : vector<2x16x64xf32> to vector<32x64xf32>
    %c4_101 = arith.constant 4 : index
    %c0_102 = arith.constant 0 : index
    %c0_103 = arith.constant 0 : index
    %156 = vector.load %arg8[%c4_101, %c0_102, %c0_103] : memref<5x64x64xf32, #tpu.memory_space<vmem>>, vector<1x64x64xf32>
    %157 = vector.shape_cast %156 : vector<1x64x64xf32> to vector<64x64xf32>
    %cst_104 = arith.constant dense<0.000000e+00> : vector<32x64xf32>
    %158 = tpu.matmul %155, %157, %cst_104 {dimension_numbers = #tpu.dot_dimension_numbers<[1], [0], [0], [1], [0, 0, 1, 1], [], []>} : vector<32x64xf32>, vector<64x64xf32>, vector<32x64xf32> -> vector<32x64xf32>
    %159 = arith.addf %153, %158 : vector<32x64xf32>
    %cst_105 = arith.constant dense<0.000000e+00> : vector<64xf32>
    %160 = vector.multi_reduction <add>, %159, %cst_105 [0] : vector<32x64xf32> to vector<64xf32>
    %161 = vector.shape_cast %160 : vector<64xf32> to vector<1x64xf32>
    %cst_106 = arith.constant 3.200000e+01 : f32
    %162 = vector.broadcast %cst_106 : f32 to vector<1x64xf32>
    %163 = arith.divf %161, %162 : vector<1x64xf32>
    %164 = arith.mulf %159, %159 : vector<32x64xf32>
    %cst_107 = arith.constant dense<0.000000e+00> : vector<64xf32>
    %165 = vector.multi_reduction <add>, %164, %cst_107 [0] : vector<32x64xf32> to vector<64xf32>
    %166 = vector.shape_cast %165 : vector<64xf32> to vector<1x64xf32>
    %cst_108 = arith.constant 3.200000e+01 : f32
    %167 = vector.broadcast %cst_108 : f32 to vector<1x64xf32>
    %168 = arith.divf %166, %167 : vector<1x64xf32>
    %169 = arith.mulf %163, %163 : vector<1x64xf32>
    %170 = arith.subf %168, %169 : vector<1x64xf32>
    %cst_109 = arith.constant 0.000000e+00 : f32
    %171 = vector.broadcast %cst_109 : f32 to vector<1x64xf32>
    %172 = arith.maximumf %170, %171 : vector<1x64xf32>
    %c0_110 = arith.constant 0 : index
    %c0_111 = arith.constant 0 : index
    %173 = vector.load %arg9[%c0_110, %c0_111] : memref<1x64xf32, #tpu.memory_space<vmem>>, vector<1x64xf32>
    %cst_112 = arith.constant 9.99999974E-6 : f32
    %174 = vector.broadcast %cst_112 : f32 to vector<1x64xf32>
    %175 = arith.addf %172, %174 : vector<1x64xf32>
    %176 = math.rsqrt %175 : vector<1x64xf32>
    %177 = arith.mulf %173, %176 : vector<1x64xf32>
    %c0_113 = arith.constant 0 : index
    %c0_114 = arith.constant 0 : index
    %178 = vector.load %arg10[%c0_113, %c0_114] : memref<1x64xf32, #tpu.memory_space<vmem>>, vector<1x64xf32>
    %179 = arith.mulf %163, %177 : vector<1x64xf32>
    %180 = arith.subf %178, %179 : vector<1x64xf32>
    %181 = vector.broadcast %177 : vector<1x64xf32> to vector<32x64xf32>
    %182 = arith.mulf %159, %181 : vector<32x64xf32>
    %183 = vector.broadcast %180 : vector<1x64xf32> to vector<32x64xf32>
    %184 = arith.addf %182, %183 : vector<32x64xf32>
    %cst_115 = arith.constant 0.000000e+00 : f32
    %185 = vector.broadcast %cst_115 : f32 to vector<32x64xf32>
    %186 = arith.cmpf ogt, %184, %185 : vector<32x64xf32>
    %cst_116 = arith.constant 2.000000e-01 : f32
    %187 = vector.broadcast %cst_116 : f32 to vector<32x64xf32>
    %188 = arith.mulf %187, %184 : vector<32x64xf32>
    %189 = arith.select %186, %184, %188 : vector<32x64xi1>, vector<32x64xf32>
    %c0_117 = arith.constant 0 : index
    %c0_118 = arith.constant 0 : index
    %190 = vector.load %arg11[%c0_117, %c0_118] : memref<64x64xf32, #tpu.memory_space<vmem>>, vector<64x64xf32>
    %cst_119 = arith.constant dense<0.000000e+00> : vector<32x64xf32>
    %191 = tpu.matmul %189, %190, %cst_119 {dimension_numbers = #tpu.dot_dimension_numbers<[1], [0], [0], [1], [0, 0, 1, 1], [], []>} : vector<32x64xf32>, vector<64x64xf32>, vector<32x64xf32> -> vector<32x64xf32>
    %c0_120 = arith.constant 0 : index
    %c0_121 = arith.constant 0 : index
    %192 = vector.load %arg12[%c0_120, %c0_121] : memref<1x64xf32, #tpu.memory_space<vmem>>, vector<1x64xf32>
    %193 = vector.broadcast %192 : vector<1x64xf32> to vector<32x64xf32>
    %194 = arith.addf %191, %193 : vector<32x64xf32>
    %cst_122 = arith.constant 0.000000e+00 : f32
    %195 = vector.broadcast %cst_122 : f32 to vector<32x64xf32>
    %196 = arith.cmpf ogt, %194, %195 : vector<32x64xf32>
    %cst_123 = arith.constant 2.000000e-01 : f32
    %197 = vector.broadcast %cst_123 : f32 to vector<32x64xf32>
    %198 = arith.mulf %197, %194 : vector<32x64xf32>
    %199 = arith.select %196, %194, %198 : vector<32x64xi1>, vector<32x64xf32>
    %c0_124 = arith.constant 0 : index
    %c0_125 = arith.constant 0 : index
    %200 = vector.load %arg13[%c0_124, %c0_125] : memref<64x128xf32, #tpu.memory_space<vmem>>, vector<64x128xf32>
    %cst_126 = arith.constant dense<0.000000e+00> : vector<32x128xf32>
    %201 = tpu.matmul %199, %200, %cst_126 {dimension_numbers = #tpu.dot_dimension_numbers<[1], [0], [0], [1], [0, 0, 1, 1], [], []>} : vector<32x64xf32>, vector<64x128xf32>, vector<32x128xf32> -> vector<32x128xf32>
    %c0_127 = arith.constant 0 : index
    %c0_128 = arith.constant 0 : index
    %202 = vector.load %arg14[%c0_127, %c0_128] : memref<1x128xf32, #tpu.memory_space<vmem>>, vector<1x128xf32>
    %203 = vector.broadcast %202 : vector<1x128xf32> to vector<32x128xf32>
    %204 = arith.addf %201, %203 : vector<32x128xf32>
    %205 = tpu.iota {dimensions = array<i32: 1>} : vector<32x128xi32>
    %c32_i32 = arith.constant 32 : i32
    %206 = vector.broadcast %c32_i32 : i32 to vector<32x128xi32>
    %207 = arith.cmpi slt, %205, %206 : vector<32x128xi32>
    %cst_129 = arith.constant 0.000000e+00 : f32
    %208 = vector.broadcast %cst_129 : f32 to vector<32x128xf32>
    %209 = arith.maximumf %204, %208 : vector<32x128xf32>
    %210 = math.absf %204 : vector<32x128xf32>
    %cst_130 = arith.constant 0.000000e+00 : f32
    %211 = vector.broadcast %cst_130 : f32 to vector<32x128xf32>
    %212 = arith.subf %211, %210 : vector<32x128xf32>
    %213 = math.exp %212 : vector<32x128xf32>
    %cst_131 = arith.constant 1.000000e+00 : f32
    %214 = vector.broadcast %cst_131 : f32 to vector<32x128xf32>
    %215 = arith.addf %214, %213 : vector<32x128xf32>
    %216 = math.log %215 : vector<32x128xf32>
    %217 = arith.addf %209, %216 : vector<32x128xf32>
    %cst_132 = arith.constant 9.99999974E-5 : f32
    %218 = vector.broadcast %cst_132 : f32 to vector<32x128xf32>
    %219 = arith.addf %217, %218 : vector<32x128xf32>
    %220 = arith.select %207, %204, %219 : vector<32x128xi1>, vector<32x128xf32>
    %221 = vector.shape_cast %220 : vector<32x128xf32> to vector<2x16x128xf32>
    %c0_133 = arith.constant 0 : index
    %c0_134 = arith.constant 0 : index
    %c0_135 = arith.constant 0 : index
    %222 = vector.load %arg15[%c0_133, %c0_134, %c0_135] : memref<2x16x128xf32, #tpu.memory_space<vmem>>, vector<2x16x128xf32>
    tpu.vector_store %arg15[%c0_133, %c0_134, %c0_135], %221 {strides = array<i32>} : memref<2x16x128xf32, #tpu.memory_space<vmem>>, vector<2x16x128xf32>,
    return
  }
  func.func @transform_0(%arg0: i32) -> (i32, i32, i32) {
    %c0_i32 = arith.constant 0 : i32
    %c0_i32_0 = arith.constant 0 : i32
    %c0_i32_1 = arith.constant 0 : i32
    %c0_i32_2 = arith.constant 0 : i32
    return %c0_i32, %c0_i32_0, %c0_i32_1 : i32, i32, i32
  }
  func.func @transform_1(%arg0: i32) -> (i32, i32, i32) {
    %c0_i32 = arith.constant 0 : i32
    %c0_i32_0 = arith.constant 0 : i32
    %c0_i32_1 = arith.constant 0 : i32
    %c0_i32_2 = arith.constant 0 : i32
    return %c0_i32, %c0_i32_0, %c0_i32_1 : i32, i32, i32
  }
  func.func @transform_2(%arg0: i32) -> (i32, i32) {
    %c0_i32 = arith.constant 0 : i32
    %c0_i32_0 = arith.constant 0 : i32
    %c0_i32_1 = arith.constant 0 : i32
    return %c0_i32, %c0_i32_0 : i32, i32
  }
  func.func @transform_3(%arg0: i32) -> (i32, i32) {
    %c0_i32 = arith.constant 0 : i32
    %c0_i32_0 = arith.constant 0 : i32
    %c0_i32_1 = arith.constant 0 : i32
    return %c0_i32, %c0_i32_0 : i32, i32
  }
  func.func @transform_4(%arg0: i32) -> (i32, i32, i32) {
    %c0_i32 = arith.constant 0 : i32
    %c0_i32_0 = arith.constant 0 : i32
    %c0_i32_1 = arith.constant 0 : i32
    %c0_i32_2 = arith.constant 0 : i32
    return %c0_i32, %c0_i32_0, %c0_i32_1 : i32, i32, i32
  }
  func.func @transform_5(%arg0: i32) -> (i32, i32) {
    %c0_i32 = arith.constant 0 : i32
    %c0_i32_0 = arith.constant 0 : i32
    %c0_i32_1 = arith.constant 0 : i32
    return %c0_i32, %c0_i32_0 : i32, i32
  }
  func.func @transform_6(%arg0: i32) -> (i32, i32) {
    %c0_i32 = arith.constant 0 : i32
    %c0_i32_0 = arith.constant 0 : i32
    %c0_i32_1 = arith.constant 0 : i32
    return %c0_i32, %c0_i32_0 : i32, i32
  }
  func.func @transform_7(%arg0: i32) -> (i32, i32, i32) {
    %c0_i32 = arith.constant 0 : i32
    %c0_i32_0 = arith.constant 0 : i32
    %c0_i32_1 = arith.constant 0 : i32
    %c0_i32_2 = arith.constant 0 : i32
    return %c0_i32, %c0_i32_0, %c0_i32_1 : i32, i32, i32
  }
  func.func @transform_8(%arg0: i32) -> (i32, i32) {
    %c0_i32 = arith.constant 0 : i32
    %c0_i32_0 = arith.constant 0 : i32
    %c0_i32_1 = arith.constant 0 : i32
    return %c0_i32, %c0_i32_0 : i32, i32
  }
  func.func @transform_9(%arg0: i32) -> (i32, i32) {
    %c0_i32 = arith.constant 0 : i32
    %c0_i32_0 = arith.constant 0 : i32
    %c0_i32_1 = arith.constant 0 : i32
    return %c0_i32, %c0_i32_0 : i32, i32
  }
  func.func @transform_10(%arg0: i32) -> (i32, i32) {
    %c0_i32 = arith.constant 0 : i32
    %c0_i32_0 = arith.constant 0 : i32
    %c0_i32_1 = arith.constant 0 : i32
    return %c0_i32, %c0_i32_0 : i32, i32
  }
  func.func @transform_11(%arg0: i32) -> (i32, i32) {
    %c0_i32 = arith.constant 0 : i32
    %c0_i32_0 = arith.constant 0 : i32
    %c0_i32_1 = arith.constant 0 : i32
    return %c0_i32, %c0_i32_0 : i32, i32
  }
  func.func @transform_12(%arg0: i32) -> (i32, i32) {
    %c0_i32 = arith.constant 0 : i32
    %c0_i32_0 = arith.constant 0 : i32
    %c0_i32_1 = arith.constant 0 : i32
    return %c0_i32, %c0_i32_0 : i32, i32
  }
  func.func @transform_13(%arg0: i32) -> (i32, i32) {
    %c0_i32 = arith.constant 0 : i32
    %c0_i32_0 = arith.constant 0 : i32
    %c0_i32_1 = arith.constant 0 : i32
    return %c0_i32, %c0_i32_0 : i32, i32
  }
  func.func @transform_14(%arg0: i32) -> (i32, i32, i32) {
    %c0_i32 = arith.constant 0 : i32
    %c0_i32_0 = arith.constant 0 : i32
    %c0_i32_1 = arith.constant 0 : i32
    %c0_i32_2 = arith.constant 0 : i32
    return %c0_i32, %c0_i32_0, %c0_i32_1 : i32, i32, i32
  }
}

</mosaic_0001>

<bundles_post_ra>
// kernel: tpu_custom_call.1
= control target key start
LH: loop header
LB: loop body
LE: loop exit
PB: predicated region body
PF: predicated region fallthrough
CT: control target
= control target key end

     0   :  { %19 = vsyncpa [#allocation4], 0  ;;  %s4131_s0 = inlined_call_operand.hbm [shape: f32[2,16,64], index: 0, kind: input, shape index: {}]   ;;  %s4132_s1 = inlined_call_operand.hbm [shape: f32[5,64,64], index: 1, kind: input, shape index: {}]   ;;  %s4133_s2 = inlined_call_operand.vmem [shape: f32[1,64], index: 2, kind: input, shape index: {}]   ;;  %s4134_s3 = inlined_call_operand.vmem [shape: f32[1,64], index: 3, kind: input, shape index: {}]   ;;  %s4135_s4 = inlined_call_operand.hbm [shape: f32[5,64,64], index: 4, kind: input, shape index: {}]   ;;  %s4136_s5 = inlined_call_operand.vmem [shape: f32[1,64], index: 5, kind: input, shape index: {}]   ;;  %s4137_s6 = inlined_call_operand.vmem [shape: f32[1,64], index: 6, kind: input, shape index: {}]   ;;  %s4138_s7 = inlined_call_operand.hbm [shape: f32[5,64,64], index: 7, kind: input, shape index: {}]   ;;  %s4139_s8 = inlined_call_operand.vmem [shape: f32[1,64], index: 8, kind: input, shape index: {}]   ;;  %s4140_s9 = inlined_call_operand.vmem [shape: f32[1,64], index: 9, kind: input, shape index: {}]   ;;  %s4141_s10 = inlined_call_operand.hbm [shape: f32[64,64], index: 10, kind: input, shape index: {}]   ;;  %s4142_s11 = inlined_call_operand.vmem [shape: f32[1,64], index: 11, kind: input, shape index: {}]   ;;  %s4143_s12 = inlined_call_operand.hbm [shape: f32[64,128], index: 12, kind: input, shape index: {}]   ;;  %s4144_s13 = inlined_call_operand.vmem [shape: f32[1,128], index: 13, kind: input, shape index: {}]   ;;  %s4145_s14 = inlined_call_operand.hbm [shape: f32[2,16,128], index: 14, kind: output, shape index: {}]  }
   0x1   :  { %20 = vsyncpa [#allocation7], 0 }
   0x2   :  { %21 = vsyncpa [#allocation10], 0 }
   0x3   :  { %22 = vsyncpa [#allocation13], 0 }
   0x4   :  { %23 = vsyncpa [#allocation5], 0  ;;  %s3582_s29 = smov [#allocation6]   ;;  %s3583_s15 = smov [#allocation9]  }
   0x5   :  { %s41_s30 = sshll.u32 %s3582_s29, 4  ;;  %s73_s16 = sshll.u32 %s3583_s15, 4  ;;  %s42_s30 = int_to_ptr.vmem [resolvable:$true] %s41_s30  ;;  %s3667_s16 = int_to_ptr.vmem [resolvable:$true] %s73_s16 }
   0x6   :  { %s3418_s19 = scalar_lea.hbm %s4132_s1, 5120 }
   0x7   :  { %p3419_p0 = scmp.ne.s32.totalorder %s4132_s1, %s3418_s19  ;;  %p3422_p1 = scmp.lt.u32.totalorder %s3418_s19, %s4132_s1 }
   0x9   :  { %p3424_p2 = pnand %p3422_p1, %p3419_p0 }
   0xb   :  { %3427 = shalt.err (!%p3424_p2)
}
   0xc   :  { %s3428_s24 = scalar_lea.vmem %s42_s30, 5120  ;;  %p3433_p4 = scmp.lt.s32.totalorder %s42_s30, %s42_s30 }
   0xd   :  { %p3429_p3 = scmp.ne.s32.totalorder %s42_s30, %s3428_s24  ;;  %p3434_p5 = scmp.lt.s32.totalorder %s3428_s24, %s3428_s24 }
   0xf   :  { %p3435_p6 = por %p3434_p5, %p3433_p4 }
  0x11   :  { %p3436_p7 = pnand %p3435_p6, %p3429_p3 }
  0x13   :  { %3439 = shalt.err (!%p3436_p7)
}
  0x14   :  { %s3584_s25 = smov 128   ;;  %s3585_s26 = smov 8  }
  0x15   :  { %47 = dma.hbm_to_vmem [thread:$0]  %s4132_s1, 5120, %s42_s30, [#allocation7], %s3584_s25, %s3584_s25, %s3585_s26  }
  0x16   :  { %s3440_s17 = scalar_lea.hbm %s4138_s7, 5120 }
  0x17   :  { %p3441_p8 = scmp.ne.s32.totalorder %s4138_s7, %s3440_s17  ;;  %p3444_p9 = scmp.lt.u32.totalorder %s3440_s17, %s4138_s7 }
  0x19   :  { %p3446_p10 = pnand %p3444_p9, %p3441_p8 }
  0x1b   :  { %3449 = shalt.err (!%p3446_p10)
}
  0x1c   :  { %s3450_s22 = scalar_lea.vmem %s3667_s16, 5120  ;;  %p3455_p12 = scmp.lt.s32.totalorder %s3667_s16, %s3667_s16 }
  0x1d   :  { %p3451_p11 = scmp.ne.s32.totalorder %s3667_s16, %s3450_s22  ;;  %p3456_p13 = scmp.lt.s32.totalorder %s3450_s22, %s3450_s22 }
  0x1f   :  { %p3457_p0 = por %p3456_p13, %p3455_p12 }
  0x21   :  { %p3458_p1 = pnand %p3457_p0, %p3451_p11 }
  0x23   :  { %3461 = shalt.err (!%p3458_p1)
}
  0x24   :  { %79 = dma.hbm_to_vmem [thread:$0]  %s4138_s7, 5120, %s3667_s16, [#allocation10], %s3584_s25, %s3584_s25, %s3585_s26  }
  0x25   :  { %s3586_s23 = smov [#allocation3]   ;;  %s3587_s27 = smov [#allocation8]  }
  0x26   :  { %s29_s24 = sshll.u32 %s3586_s23, 4  ;;  %s57_s28 = sshll.u32 %s3587_s27, 4  ;;  %s30_s24 = int_to_ptr.vmem [resolvable:$true] %s29_s24  ;;  %s3704_s28 = int_to_ptr.vmem [resolvable:$true] %s57_s28 }
  0x27   :  { %s3462_s17 = scalar_lea.hbm %s4131_s0, 512 }
  0x28   :  { %p3463_p2 = scmp.ne.s32.totalorder %s4131_s0, %s3462_s17  ;;  %p3466_p3 = scmp.lt.u32.totalorder %s3462_s17, %s4131_s0 }
  0x2a   :  { %p3468_p4 = pnand %p3466_p3, %p3463_p2 }
  0x2c   :  { %3471 = shalt.err (!%p3468_p4)
}
  0x2d   :  { %s3472_s7 = scalar_lea.vmem %s30_s24, 512  ;;  %p3477_p6 = scmp.lt.s32.totalorder %s30_s24, %s30_s24 }
  0x2e   :  { %p3473_p5 = scmp.ne.s32.totalorder %s30_s24, %s3472_s7  ;;  %p3478_p7 = scmp.lt.s32.totalorder %s3472_s7, %s3472_s7 }
  0x30   :  { %p3479_p8 = por %p3478_p7, %p3477_p6 }
  0x32   :  { %p3480_p9 = pnand %p3479_p8, %p3473_p5 }
  0x34   :  { %3483 = shalt.err (!%p3480_p9)
}
  0x35   :  { %35 = dma.hbm_to_vmem [thread:$0]  %s4131_s0, 512, %s30_s24, [#allocation4], %s3584_s25, %s3584_s25, %s3585_s26  }
  0x36   :  { %s3484_s23 = scalar_lea.hbm %s4135_s4, 5120 }
  0x37   :  { %p3485_p10 = scmp.ne.s32.totalorder %s4135_s4, %s3484_s23  ;;  %p3488_p11 = scmp.lt.u32.totalorder %s3484_s23, %s4135_s4 }
  0x39   :  { %p3490_p12 = pnand %p3488_p11, %p3485_p10 }
  0x3b   :  { %3493 = shalt.err (!%p3490_p12)
}
  0x3c   :  { %s3494_s18 = scalar_lea.vmem %s3704_s28, 5120  ;;  %p3499_p0 = scmp.lt.s32.totalorder %s3704_s28, %s3704_s28 }
  0x3d   :  { %p3495_p13 = scmp.ne.s32.totalorder %s3704_s28, %s3494_s18  ;;  %p3500_p1 = scmp.lt.s32.totalorder %s3494_s18, %s3494_s18 }
  0x3f   :  { %p3501_p2 = por %p3500_p1, %p3499_p0 }
  0x41   :  { %p3502_p3 = pnand %p3501_p2, %p3495_p13 }
  0x43   :  { %3505 = shalt.err (!%p3502_p3)
}
  0x44   :  { %63 = dma.hbm_to_vmem [thread:$0]  %s4135_s4, 5120, %s3704_s28, [#allocation7], %s3584_s25, %s3584_s25, %s3585_s26  }
  0x45   :  { %s3588_s19 = smov [#allocation11]   ;;  %s3589_s21 = smov [#allocation12]  }
  0x46   :  { %s89_s20 = sshll.u32 %s3588_s19, 4  ;;  %s103_s7 = sshll.u32 %s3589_s21, 4  ;;  %s90_s20 = int_to_ptr.vmem [resolvable:$true] %s89_s20  ;;  %s3741_s7 = int_to_ptr.vmem [resolvable:$true] %s103_s7 }
  0x47   :  { %s3506_s1 = scalar_lea.hbm %s4141_s10, 1024 }
  0x48   :  { %p3507_p4 = scmp.ne.s32.totalorder %s4141_s10, %s3506_s1  ;;  %p3510_p5 = scmp.lt.u32.totalorder %s3506_s1, %s4141_s10 }
  0x4a   :  { %p3512_p6 = pnand %p3510_p5, %p3507_p4 }
  0x4c   :  { %3515 = shalt.err (!%p3512_p6)
}
  0x4d   :  { %s3516_s4 = scalar_lea.vmem %s90_s20, 1024  ;;  %p3521_p8 = scmp.lt.s32.totalorder %s90_s20, %s90_s20 }
  0x4e   :  { %p3517_p7 = scmp.ne.s32.totalorder %s90_s20, %s3516_s4  ;;  %p3522_p9 = scmp.lt.s32.totalorder %s3516_s4, %s3516_s4 }
  0x50   :  { %p3523_p10 = por %p3522_p9, %p3521_p8 }
  0x52   :  { %p3524_p11 = pnand %p3523_p10, %p3517_p7 }
  0x54   :  { %3527 = shalt.err (!%p3524_p11)
}
  0x55   :  { %95 = dma.hbm_to_vmem [thread:$0]  %s4141_s10, 1024, %s90_s20, [#allocation10], %s3584_s25, %s3584_s25, %s3585_s26  }
  0x56   :  { %s3528_s0 = scalar_lea.hbm %s4143_s12, 1024 }
  0x57   :  { %p3529_p12 = scmp.ne.s32.totalorder %s4143_s12, %s3528_s0  ;;  %p3532_p13 = scmp.lt.u32.totalorder %s3528_s0, %s4143_s12 }
  0x59   :  { %p3534_p0 = pnand %p3532_p13, %p3529_p12 }
  0x5b   :  { %3537 = shalt.err (!%p3534_p0)
}
  0x5c   :  { %s3538_s22 = scalar_lea.vmem %s3741_s7, 1024  ;;  %p3543_p2 = scmp.lt.s32.totalorder %s3741_s7, %s3741_s7 }
  0x5d   :  { %p3539_p1 = scmp.ne.s32.totalorder %s3741_s7, %s3538_s22  ;;  %p3544_p3 = scmp.lt.s32.totalorder %s3538_s22, %s3538_s22 }
  0x5f   :  { %p3545_p4 = por %p3544_p3, %p3543_p2 }
  0x61   :  { %p3546_p5 = pnand %p3545_p4, %p3539_p1 }
  0x63   :  { %3549 = shalt.err (!%p3546_p5)
}
  0x64   :  { %109 = dma.hbm_to_vmem [thread:$0]  %s4143_s12, 1024, %s3741_s7, [#allocation13], %s3584_s25, %s3584_s25, %s3585_s26  }
  0x65   :  { %3572 = dma.done.wait [#allocation4], 512  }
  0x66   :  { %3573 = vsyncadd [#allocation4], 4294966784 }
  0x67   :  { %3574 = dma.done.wait [#allocation7], 10240  }
  0x68   :  { %3575 = vsyncadd [#allocation7], 4294957056 }
  0x69   :  { %3576 = dma.done.wait [#allocation10], 6144  }
  0x6a   :  { %3577 = vsyncadd [#allocation10], 4294961152 }
  0x6b   :  { %3578 = dma.done.wait [#allocation13], 1024  }
  0x6c   :  { %3579 = vsyncadd [#allocation13], 4294966272  ;;  %vm130_vm0 = vcmask 523264   ;;  %v3590_v0 = vmov 0.0   ;;  %v168_v1 = vld [vmem:[#allocation6] sm:$0xff]  ;;  %v169_v2 = vld [vmem:[#allocation6 + $0x8] sm:$0xff] }
  0x6d   :  { %131 = vst.msk [vmem:[#allocation2] sm:$0xff] %vm130_vm0, %v3590_v0  ;;  %132 = vst.msk [vmem:[#allocation2 + $0x20] sm:$0xff] %vm130_vm0, %v3590_v0  ;;  %v170_v3 = vld [vmem:[#allocation6 + $0x10] sm:$0xff]  ;;  %v3080_v4 = vpack.c.bf16 %v169_v2, %v168_v1  ;;  %v171_v5 = vld [vmem:[#allocation6 + $0x18] sm:$0xff]  ;;  %vm157_vm1 = vcmask 1041408   ;;  %vm176_vm2 = vcmask 1040384  }
  0x6e   :  { %133 = vst.msk [vmem:[#allocation2 + $0x18] sm:$0xff] %vm130_vm0, %v3590_v0  ;;  %134 = vst.msk [vmem:[#allocation2 + $0x38] sm:$0xff] %vm130_vm0, %v3590_v0  ;;  %v3084_v6 = vpack.c.bf16 %v171_v5, %v170_v3  ;;  %v172_v7 = vld [vmem:[#allocation6 + $0x20] sm:$0xff]  ;;  %v173_v8 = vld [vmem:[#allocation6 + $0x28] sm:$0xff]  ;;  %vm490_vm3 = vcmask 1046528   ;;  %vm607_vm4 = vcmask 1045504  }
  0x6f   :  { %v135_v9 = vld [vmem:[#allocation3] sm:$0xff]  ;;  %3081 = vmatprep.subr.bf16.mxu0 %v3080_v4  ;;  %v136_v10 = vld [vmem:[#allocation3 + $0x8] sm:$0xff]  ;;  %v3088_v11 = vpack.c.bf16 %v173_v8, %v172_v7  ;;  %v137_v12 = vld [vmem:[#allocation3 + $0x10] sm:$0xff] }
  0x70   :  { %139 = vst.msk [vmem:[#allocation2 + $0x8] sm:$0xff] %vm130_vm0, %v135_v9  ;;  %3083 = vmatpush3.bf16.msra.mxu0 %v3080_v4  ;;  %140 = vst.msk [vmem:[#allocation2 + $0x10] sm:$0xff] %vm130_vm0, %v136_v10  ;;  %v174_v13 = vld [vmem:[#allocation6 + $0x30] sm:$0xff]  ;;  %v175_v14 = vld [vmem:[#allocation6 + $0x38] sm:$0xff] }
  0x71   :  { %3085 = vmatprep.subr.bf16.mxu0 %v3084_v6  ;;  %141 = vst.msk [vmem:[#allocation2 + $0x28] sm:$0xff] %vm130_vm0, %v137_v12  ;;  %v138_v16 = vld [vmem:[#allocation3 + $0x18] sm:$0xff]  ;;  %v3092_v17 = vpack.c.bf16 %v175_v14, %v174_v13  ;;  %v383_v19 = vld [vmem:[#allocation6 + $0x80] sm:$0xff]  ;;  %v384_v20 = vld [vmem:[#allocation6 + $0x88] sm:$0xff] }
  0x72   :  { %142 = vst.msk [vmem:[#allocation2 + $0x30] sm:$0xff] %vm130_vm0, %v138_v16  ;;  %v188_v23 = vld [vmem:[#allocation6 + $0x40] sm:$0xff]  ;;  %v189_v24 = vld [vmem:[#allocation6 + $0x48] sm:$0xff]  ;;  %v3096_v29 = vpack.c.bf16 %v384_v20, %v383_v19  ;;  %v190_v31 = vld [vmem:[#allocation6 + $0x50] sm:$0xff] }
  0x73   :  { %v3064_v27 = vpack.c.bf16 %v189_v24, %v188_v23  ;;  %v191_v32 = vld [vmem:[#allocation6 + $0x58] sm:$0xff]  ;;  %v385_v35 = vld [vmem:[#allocation6 + $0x90] sm:$0xff]  ;;  %v192_v41 = vld [vmem:[#allocation6 + $0x60] sm:$0xff] }
  0x74   :  { %v3784_v15 = vld [vmem:[#allocation2] sm:$0xff]  ;;  %3087 = vmatpush3.bf16.msra.mxu0 %v3084_v6  ;;  %v3068_v38 = vpack.c.bf16 %v191_v32, %v190_v31  ;;  %v386_v39 = vld [vmem:[#allocation6 + $0x98] sm:$0xff]  ;;  %v193_v42 = vld [vmem:[#allocation6 + $0x68] sm:$0xff] }
  0x75   :  { %3089 = vmatprep.subr.bf16.mxu0 %v3088_v11  ;;  %v158_v18 = vrot.slane %v3784_v15, 6  ;;  %v3789_v21 = vld [vmem:[#allocation2 + $0x20] sm:$0xff]  ;;  %v3794_v25 = vrot.slane %v3784_v15, 7  ;;  %3065 = vmatprep.subr.bf16.mxu1 %v3064_v27  ;;  %v3072_v45 = vpack.c.bf16 %v193_v42, %v192_v41  ;;  %v194_v48 = vld [vmem:[#allocation6 + $0x70] sm:$0xff]  ;;  %v195_v49 = vld [vmem:[#allocation6 + $0x78] sm:$0xff]  ;;  %v3100_v50 = vpack.c.bf16 %v386_v39, %v385_v35 }
  0x76   :  { %v163_v37 = vrot.slane %v3789_v21, 6  ;;  %3067 = vmatpush3.bf16.msra.mxu1 %v3064_v27  ;;  %v387_v52 = vld [vmem:[#allocation6 + $0xa0] sm:$0xff]  ;;  %v388_v53 = vld [vmem:[#allocation6 + $0xa8] sm:$0xff]  ;;  %v3076_v54 = vpack.c.bf16 %v195_v49, %v194_v48  ;;  %v389_v57 = vld [vmem:[#allocation6 + $0xb0] sm:$0xff]  ;;  %v3825_v60 = vrot.slane %v3789_v21, 7 }
  0x77   :  { %v3791_v22 = vld [vmem:[#allocation2 + $0x8] sm:$0xff]  ;;  %v3798_v30 = vld [vmem:[#allocation2 + $0x10] sm:$0xff]  ;;  %3069 = vmatprep.subr.bf16.mxu1 %v3068_v38  ;;  %v3104_v56 = vpack.c.bf16 %v388_v53, %v387_v52  ;;  %v390_v58 = vld [vmem:[#allocation6 + $0xb8] sm:$0xff] }
  0x78   :  { %v159_v26 = vrot.slane %v3791_v22, 6  ;;  %v178_v28 = vrot.slane %v3791_v22, 7  ;;  %3091 = vmatpush3.bf16.msra.mxu0 %v3088_v11  ;;  %v161_v34 = vrot.slane %v3798_v30, 6  ;;  %v3804_v36 = vld [vmem:[#allocation2 + $0x28] sm:$0xff]  ;;  %v180_v59 = vrot.slane %v3798_v30, 7  ;;  %v502_v63 = vld [vmem:[#allocation6 + $0xc0] sm:$0xff] }
  0x79   :  { %3093 = vmatprep.subr.bf16.mxu0 %v3092_v17  ;;  %v164_v40 = vrot.slane %v3804_v36, 6  ;;  %v3811_v44 = vld [vmem:[#allocation2 + $0x30] sm:$0xff]  ;;  %v183_v61 = vrot.slane %v3804_v36, 7  ;;  %v3108_v62 = vpack.c.bf16 %v390_v58, %v389_v57  ;;  %v503_v0 = vld [vmem:[#allocation6 + $0xc8] sm:$0xff]  ;;  %v505_v6 = vld [vmem:[#allocation6 + $0xd8] sm:$0xff]  ;;  %v491_v9 = vrot.slane %v3791_v22, 1 }
  0x7a   :  { %v160_v33 = vsel %vm157_vm1, %v158_v18, %v159_v26  ;;  %v179_v43 = vsel %vm176_vm2, %v3794_v25, %v178_v28  ;;  %v162_v46 = vsel %vm157_vm1, %v159_v26, %v161_v34  ;;  %v166_v47 = vrot.slane %v3811_v44, 6  ;;  %3071 = vmatpush3.bf16.msra.mxu1 %v3068_v38  ;;  %v504_v5 = vld [vmem:[#allocation6 + $0xd0] sm:$0xff]  ;;  %v506_v11 = vld [vmem:[#allocation6 + $0xe0] sm:$0xff]  ;;  %v507_v12 = vld [vmem:[#allocation6 + $0xe8] sm:$0xff] }
  0x7b   :  { %2728 = vmatprep.mubr.msk.f32.mxu0 %vm130_vm0, %v160_v33  ;;  %2706 = vmatprep.mubr.msk.f32.mxu1 %vm130_vm0, %v179_v43  ;;  %v165_v51 = vsel %vm157_vm1, %v163_v37, %v164_v40  ;;  %v181_v1 = vsel %vm176_vm2, %v178_v28, %v180_v59  ;;  %v185_v2 = vrot.slane %v3811_v44, 7  ;;  %v184_v3 = vsel %vm176_vm2, %v3825_v60, %v183_v61  ;;  %v508_v16 = vld [vmem:[#allocation6 + $0xf0] sm:$0xff]  ;;  %v3848_v20 = vld [vmem:[#allocation2 + $0x18] sm:$0xff]  ;;  %v619_v23 = vld [vmem:[#allocation6 + $0x100] sm:$0xff] }
  0x7c   :  { %3095 = vmatpush3.bf16.msra.mxu0 %v3092_v17  ;;  %3073 = vmatprep.subr.bf16.mxu1 %v3072_v45  ;;  %v167_v55 = vsel %vm157_vm1, %v164_v40, %v166_v47  ;;  %v3112_v4 = vpack.c.bf16 %v503_v0, %v502_v63  ;;  %v3116_v8 = vpack.c.bf16 %v505_v6, %v504_v5  ;;  %v492_v10 = vrot.slane %v3798_v30, 1  ;;  %v509_v17 = vld [vmem:[#allocation6 + $0xf8] sm:$0xff]  ;;  %v620_v24 = vld [vmem:[#allocation6 + $0x108] sm:$0xff]  ;;  %v621_v32 = vld [vmem:[#allocation6 + $0x110] sm:$0xff] }
  0x7d   :  { %3097 = vmatprep.subr.bf16.mxu0 %v3096_v29  ;;  %v186_v7 = vsel %vm176_vm2, %v183_v61, %v185_v2  ;;  %v3120_v13 = vpack.c.bf16 %v507_v12, %v506_v11  ;;  %v3124_v19 = vpack.c.bf16 %v509_v17, %v508_v16  ;;  %v494_v26 = vrot.slane %v3848_v20, 1  ;;  %v150_v31 = vld [vmem:[#allocation2 + $0x38] sm:$0xff]  ;;  %v623_v42 = vld [vmem:[#allocation6 + $0x120] sm:$0xff]  ;;  %v624_v43 = vld [vmem:[#allocation6 + $0x128] sm:$0xff] }
  0x7e   :  { %3075 = vmatpush3.bf16.msra.mxu1 %v3072_v45  ;;  %v493_v14 = vsel %vm490_vm3, %v491_v9, %v492_v10  ;;  %v3128_v27 = vpack.c.bf16 %v620_v24, %v619_v23  ;;  %v496_v28 = vrot.slane %v3804_v36, 1  ;;  %v622_v33 = vld [vmem:[#allocation6 + $0x118] sm:$0xff]  ;;  %v3856_v35 = vrot.slane %v150_v31, 1  ;;  %v625_v48 = vld [vmem:[#allocation6 + $0x130] sm:$0xff]  ;;  %v850_v61 = vld [vmem:[#allocation8 + $0x60] sm:$0xff] }
  0x7f   :  { %2729 = vmatmul.mubr.msk.f32.vlgmr.msra.gmra.mrb[0].mxu0 %vm130_vm0, %v162_v46  ;;  %3077 = vmatprep.subr.bf16.mxu1 %v3076_v54  ;;  %v495_v34 = vsel %vm490_vm3, %v492_v10, %v494_v26  ;;  %v3132_v38 = vpack.c.bf16 %v622_v33, %v621_v32  ;;  %v608_v40 = vrot.slane %v3791_v22, 2  ;;  %v609_v41 = vrot.slane %v3798_v30, 2  ;;  %v626_v49 = vld [vmem:[#allocation6 + $0x138] sm:$0xff]  ;;  %v848_v57 = vld [vmem:[#allocation8 + $0x50] sm:$0xff]  ;;  %v1159_v21 = vld [vmem:[#allocation8 + $0xc0] sm:$0xff] }
  0x80   :  { %3099 = vmatpush3.bf16.msra.mxu0 %v3096_v29  ;;  %2731 = vmatprep.mubr.msk.f32.mxu0 %vm130_vm0, %v165_v51  ;;  %v497_v29 = vrot.slane %v3811_v44, 1  ;;  %v3136_v46 = vpack.c.bf16 %v624_v43, %v623_v42  ;;  %v614_v51 = vrot.slane %v3811_v44, 2  ;;  %v3874_v53 = vrot.slane %v150_v31, 2  ;;  %v849_v58 = vld [vmem:[#allocation8 + $0x58] sm:$0xff]  ;;  %v852_v63 = vld [vmem:[#allocation8 + $0x70] sm:$0xff] }
  0x81   :  { %3101 = vmatprep.subr.bf16.mxu0 %v3100_v50  ;;  %v610_v47 = vsel %vm607_vm4, %v608_v40, %v609_v41  ;;  %v3148_v59 = vpack.c.bf16 %v849_v58, %v848_v57 }
  0x82   :  { %3079 = vmatpush3.bf16.msra.mxu1 %v3076_v54  ;;  %v498_v39 = vsel %vm490_vm3, %v496_v28, %v497_v29  ;;  %v500_v45 = vsel %vm490_vm3, %v497_v29, %v3856_v35 }
  0x83   :  { %2732 = vmatmul.mubr.msk.f32.gmra.mrb[2].mxu0 %vm130_vm0, %v167_v55  ;;  %v617_v55 = vsel %vm607_vm4, %v614_v51, %v3874_v53 }
  0x84   :  { %3103 = vmatpush3.bf16.msra.mxu0 %v3100_v50  ;;  %2750 = vmatprep.mubr.msk.f32.mxu0 %vm130_vm0, %v3791_v22  ;;  %v3140_v22 = vpack.c.bf16 %v626_v49, %v625_v48  ;;  %v613_v50 = vrot.slane %v3804_v36, 2 }
  0x85   :  { %3105 = vmatprep.subr.bf16.mxu0 %v3104_v56  ;;  %2707 = vmatmul.mubr.msk.f32.vlgmr.msra.gmra.mrb[0].mxu1 %vm130_vm0, %v181_v1  ;;  %v853_v1 = vld [vmem:[#allocation8 + $0x78] sm:$0xff] }
  0x86   :  { %2709 = vmatprep.mubr.msk.f32.mxu1 %vm130_vm0, %v184_v3  ;;  %v615_v54 = vsel %vm607_vm4, %v613_v50, %v614_v51  ;;  %v3156_v2 = vpack.c.bf16 %v853_v1, %v852_v63  ;;  %v827_v3 = vld [vmem:[#allocation8] sm:$0xff]  ;;  %v768_v1 = vlaneseq }
  0x88   :  { %3107 = vmatpush3.bf16.msra.mxu0 %v3104_v56 }
  0x89   :  { %3109 = vmatprep.subr.bf16.mxu0 %v3108_v62  ;;  %2710 = vmatmul.mubr.msk.f32.gmra.mrb[2].mxu1 %vm130_vm0, %v186_v7 }
  0x8c   :  { %3111 = vmatpush3.bf16.msra.mxu0 %v3108_v62  ;;  %v851_v62 = vld [vmem:[#allocation8 + $0x68] sm:$0xff] }
  0x8d   :  { %3113 = vmatprep.subr.bf16.mxu0 %v3112_v4  ;;  %v3152_v0 = vpack.c.bf16 %v851_v62, %v850_v61 }
  0x8f   :  { %2751 = vmatmul.mubr.msk.f32.vlgmr.msra.gmra.mrb[0].mxu0 %vm130_vm0, %v3798_v30  ;;  %v611_v30 = vrot.slane %v3848_v20, 2  ;;  %v1504_v20 = vld [vmem:[#allocation9 + $0x58] sm:$0xff] }
  0x90   :  { %3115 = vmatpush3.bf16.msra.mxu0 %v3112_v4  ;;  %2753 = vmatprep.mubr.msk.f32.mxu0 %vm130_vm0, %v3804_v36  ;;  %v846_v36 = vld [vmem:[#allocation8 + $0x40] sm:$0xff]  ;;  %v828_v4 = vld [vmem:[#allocation8 + $0x8] sm:$0xff] }
  0x91   :  { %3117 = vmatprep.subr.bf16.mxu0 %v3116_v8  ;;  %v612_v52 = vsel %vm607_vm4, %v609_v41, %v611_v30  ;;  %v3882_v5 = vpack.c.bf16 %v828_v4, %v827_v3  ;;  %v760_v3 = vld [vmem:[%s4133_s2] sm:$0x1] }
  0x93   :  { %2754 = vmatmul.mubr.msk.f32.gmra.mrb[2].mxu0 %vm130_vm0, %v3811_v44  ;;  %v847_v44 = vld [vmem:[#allocation8 + $0x48] sm:$0xff] }
  0x94   :  { %3119 = vmatpush3.bf16.msra.mxu0 %v3116_v8  ;;  %2772 = vmatprep.mubr.msk.f32.mxu0 %vm130_vm0, %v493_v14  ;;  %v3144_v56 = vpack.c.bf16 %v847_v44, %v846_v36 }
  0x95   :  { %3121 = vmatprep.subr.bf16.mxu0 %v3120_v13 }
  0x96   :  { %3145 = vmatprep.subr.bf16.mxu1 %v3144_v56 }
  0x97   :  { %3147 = vmatpush3.bf16.msra.mxu1 %v3144_v56 }
  0x98   :  { %3123 = vmatpush3.bf16.msra.mxu0 %v3120_v13  ;;  %3149 = vmatprep.subr.bf16.mxu1 %v3148_v59 }
  0x99   :  { %3125 = vmatprep.subr.bf16.mxu0 %v3124_v19 }
  0x9b   :  { %3151 = vmatpush3.bf16.msra.mxu1 %v3148_v59 }
  0x9c   :  { %3127 = vmatpush3.bf16.msra.mxu0 %v3124_v19  ;;  %3153 = vmatprep.subr.bf16.mxu1 %v3152_v0 }
  0x9d   :  { %3129 = vmatprep.subr.bf16.mxu0 %v3128_v27 }
  0x9f   :  { %2773 = vmatmul.mubr.msk.f32.vlgmr.msra.gmra.mrb[0].mxu0 %vm130_vm0, %v495_v34  ;;  %3155 = vmatpush3.bf16.msra.mxu1 %v3152_v0 }
  0xa0   :  { %3131 = vmatpush3.bf16.msra.mxu0 %v3128_v27  ;;  %2775 = vmatprep.mubr.msk.f32.mxu0 %vm130_vm0, %v498_v39 }
  0xa1   :  { %3133 = vmatprep.subr.bf16.mxu0 %v3132_v38  ;;  %3157 = vmatprep.subr.bf16.mxu1 %v3156_v2 }
  0xa3   :  { %2776 = vmatmul.mubr.msk.f32.gmra.mrb[2].mxu0 %vm130_vm0, %v500_v45  ;;  %3159 = vmatpush3.bf16.msra.mxu1 %v3156_v2  ;;  %v769_v2 = vshrl.u32 %v768_v1, 7 }
  0xa4   :  { %3135 = vmatpush3.bf16.msra.mxu0 %v3132_v38  ;;  %2794 = vmatprep.mubr.msk.f32.mxu0 %vm130_vm0, %v610_v47 }
  0xa5   :  { %3137 = vmatprep.subr.bf16.mxu0 %v3136_v46  ;;  %3161 = vmatprep.subr.bf16.mxu1 %v3882_v5  ;;  %v3897_v4 = vsub.s32 0, %v769_v2 }
  0xa8   :  { %3139 = vmatpush3.bf16.msra.mxu0 %v3136_v46 }
  0xa9   :  { %3141 = vmatprep.subr.bf16.mxu0 %v3140_v22 }
  0xac   :  { %3143 = vmatpush3.bf16.msra.mxu0 %v3140_v22 }
  0xaf   :  { %2795 = vmatmul.mubr.msk.f32.vlgmr.msra.gmra.mrb[0].mxu0 %vm130_vm0, %v612_v52 }
  0xb0   :  { %2797 = vmatprep.mubr.msk.f32.mxu0 %vm130_vm0, %v615_v54 }
  0xb3   :  { %2798 = vmatmul.mubr.msk.f32.gmra.mrb[2].mxu0 %vm130_vm0, %v617_v55 }
 0x158   :  { %v2708_v6 = vpop.f32.mrb[0].mxu1 }
 0x159   :  { %v270_v7 = vpop.f32.mrb[1].mxu1 }
 0x15c   :  { %v2711_v8 = vpop.f32.mrb[2].mxu1 }
 0x15d   :  { %v280_v9 = vpop.f32.mrb[3].mxu1 }
 0x182   :  { %v2796_v10 = vpop.f32.mrb[0].mxu0 }
 0x183   :  { %v3336_v11 = vadd.f32 %v2796_v10, %v2708_v6  ;;  %v701_v12 = vpop.f32.mrb[1].mxu0 }
 0x184   :  { %v3337_v13 = vadd.f32 %v701_v12, %v270_v7 }
 0x185   :  { %v725_v14 = vsel %vm130_vm0, %v3336_v11, 0.0  ;;  %v740_v16 = vmul.f32 %v3336_v11, %v3336_v11 }
 0x186   :  { %v724_v17 = vsel %vm130_vm0, %v3337_v13, 0.0  ;;  %v739_v19 = vmul.f32 %v3337_v13, %v3337_v13  ;;  %v2799_v23 = vpop.f32.mrb[2].mxu0 }
 0x187   :  { %v744_v24 = vsel %vm130_vm0, %v740_v16, 0.0  ;;  %v726_v27 = vadd.f32 %v725_v14, %v724_v17  ;;  %v3338_v28 = vadd.f32 %v2799_v23, %v2711_v8  ;;  %v711_v29 = vpop.f32.mrb[3].mxu0  ;;  %v764_v8 = vld [vmem:[%s4134_s3] sm:$0x1] }
 0x188   :  { %v743_v31 = vsel %vm130_vm0, %v739_v19, 0.0  ;;  %v3339_v32 = vadd.f32 %v711_v29, %v280_v9 }
 0x189   :  { %v745_v33 = vadd.f32 %v744_v24, %v743_v31  ;;  %v742_v34 = vmul.f32 %v3338_v28, %v3338_v28  ;;  %v729_v41 = vsel %vm130_vm0, %v3338_v28, 0.0 }
 0x18a   :  { %v727_v38 = vsel %vm130_vm0, %v3339_v32, 0.0  ;;  %v741_v39 = vmul.f32 %v3339_v32, %v3339_v32 }
 0x18b   :  { %v728_v40 = vadd.f32 %v727_v38, %v726_v27  ;;  %v748_v46 = vsel %vm130_vm0, %v742_v34, 0.0 }
 0x18c   :  { %v746_v42 = vsel %vm130_vm0, %v741_v39, 0.0 }
 0x18d   :  { %v730_v43 = vadd.f32 %v729_v41, %v728_v40  ;;  %v747_v45 = vadd.f32 %v746_v42, %v745_v33 }
 0x18f   :  { %v731_v47 = vrot.slane %v730_v43, 4  ;;  %v749_v48 = vadd.f32 %v748_v46, %v747_v45 }
 0x191   :  { %v732_v49 = vadd.f32 %v731_v47, %v730_v43  ;;  %v750_v22 = vrot.slane %v749_v48, 4 }
 0x193   :  { %v733_v50 = vrot.slane %v732_v49, 2  ;;  %v751_v51 = vadd.f32 %v750_v22, %v749_v48 }
 0x195   :  { %v734_v52 = vadd.f32 %v733_v50, %v732_v49  ;;  %v752_v54 = vrot.slane %v751_v51, 2 }
 0x197   :  { %v735_v55 = vrot.slane %v734_v52, 1  ;;  %v753_v36 = vadd.f32 %v752_v54, %v751_v51  ;;  %v831_v54 = vld [vmem:[#allocation8 + $0x20] sm:$0xff] }
 0x199   :  { %v736_v44 = vadd.f32 %v735_v55, %v734_v52  ;;  %v754_v56 = vrot.slane %v753_v36, 1  ;;  %v832_v55 = vld [vmem:[#allocation8 + $0x28] sm:$0xff] }
 0x19b   :  { %v738_v57 = vmul.f32 0.03125, %v736_v44  ;;  %v755_v58 = vadd.f32 %v754_v56, %v753_v36  ;;  %v3168_v56 = vpack.c.bf16 %v832_v55, %v831_v54  ;;  %v1279_v55 = vld [vmem:[#allocation8 + $0x120] sm:$0xff] }
 0x19d   :  { %v756_v59 = vmul.f32 0.03125, %v755_v58  ;;  %v757_v61 = vmul.f32 %v738_v57, %v738_v57  ;;  %v833_v58 = vld [vmem:[#allocation8 + $0x30] sm:$0xff] }
 0x19f   :  { %v758_v62 = vsub.f32 %v756_v59, %v757_v61  ;;  %v834_v59 = vld [vmem:[#allocation8 + $0x38] sm:$0xff] }
 0x1a1   :  { %v759_v63 = vmax.f32 %v758_v62, 0.0  ;;  %v3172_v62 = vpack.c.bf16 %v834_v59, %v833_v58 }
 0x1a3   :  { %v761_v0 = vadd.f32 1e-05, %v759_v63  ;;  %v1042_v63 = vld [vmem:[#allocation8 + $0x88] sm:$0xff] }
 0x1a5   :  { %3394 = vrsqrt.f32 %v761_v0 }
 0x1af   :  { %v3395_v6 = vpop.eup %3394 }
 0x1b0   :  { %v763_v7 = vmul.f32 %v3395_v6, %v760_v3  ;;  %v1043_v3 = vld [vmem:[#allocation8 + $0x90] sm:$0xff]  ;;  %v1044_v6 = vld [vmem:[#allocation8 + $0x98] sm:$0xff] }
 0x1b1   :  { %v3180_v15 = vpack.c.bf16 %v1044_v6, %v1043_v3  ;;  %v1501_v3 = vld [vmem:[#allocation9 + $0x40] sm:$0xff] }
 0x1b2   :  { %v765_v9 = vmul.f32 %v763_v7, %v738_v57  ;;  %v771_v10 = vrot.slane %v763_v7, %v3897_v4 }
 0x1b4   :  { %v766_v12 = vsub.f32 %v764_v8, %v765_v9  ;;  %v773_v14 = vmul.f32 %v3337_v13, %v771_v10  ;;  %v774_v16 = vmul.f32 %v3336_v11, %v771_v10  ;;  %v775_v17 = vmul.f32 %v3339_v32, %v771_v10  ;;  %v830_v32 = vld [vmem:[#allocation8 + $0x18] sm:$0xff]  ;;  %v1045_v9 = vld [vmem:[#allocation8 + $0xa0] sm:$0xff] }
 0x1b5   :  { %v776_v19 = vmul.f32 %v3338_v28, %v771_v10  ;;  %v829_v28 = vld [vmem:[#allocation8 + $0x10] sm:$0xff]  ;;  %v1046_v10 = vld [vmem:[#allocation8 + $0xa8] sm:$0xff] }
 0x1b6   :  { %v781_v23 = vrot.slane %v766_v12, %v3897_v4  ;;  %v3164_v51 = vpack.c.bf16 %v830_v32, %v829_v28  ;;  %v1275_v32 = vld [vmem:[#allocation8 + $0x100] sm:$0xff] }
 0x1b8   :  { %v783_v24 = vadd.f32 %v781_v23, %v773_v14  ;;  %v784_v27 = vadd.f32 %v781_v23, %v774_v16  ;;  %v785_v29 = vadd.f32 %v781_v23, %v775_v17  ;;  %v786_v31 = vadd.f32 %v781_v23, %v776_v19  ;;  %v1047_v17 = vld [vmem:[#allocation8 + $0xb0] sm:$0xff]  ;;  %v1048_v19 = vld [vmem:[#allocation8 + $0xb8] sm:$0xff] }
 0x1b9   :  { %v3184_v14 = vpack.c.bf16 %v1046_v10, %v1045_v9  ;;  %v3188_v23 = vpack.c.bf16 %v1048_v19, %v1047_v17  ;;  %v1508_v9 = vld [vmem:[#allocation9 + $0x78] sm:$0xff] }
 0x1ba   :  { %vm787_vm5 = vcmp.gt.f32.partialorder %v783_v24, 0.0  ;;  %vm788_vm6 = vcmp.gt.f32.partialorder %v784_v27, 0.0  ;;  %vm789_vm7 = vcmp.gt.f32.partialorder %v785_v29, 0.0  ;;  %vm790_vm8 = vcmp.gt.f32.partialorder %v786_v31, 0.0 }
 0x1bb   :  { %v791_v33 = vmul.f32 0.2, %v783_v24  ;;  %v792_v34 = vmul.f32 0.2, %v784_v27  ;;  %v793_v38 = vmul.f32 0.2, %v785_v29 }
 0x1bc   :  { %v794_v39 = vmul.f32 0.2, %v786_v31 }
 0x1bd   :  { %v795_v40 = vsel %vm787_vm5, %v783_v24, %v791_v33  ;;  %v796_v41 = vsel %vm788_vm6, %v784_v27, %v792_v34  ;;  %v797_v13 = vsel %vm789_vm7, %v785_v29, %v793_v38  ;;  %v1160_v24 = vld [vmem:[#allocation8 + $0xc8] sm:$0xff]  ;;  %v1161_v27 = vld [vmem:[#allocation8 + $0xd0] sm:$0xff]  ;;  %v1162_v29 = vld [vmem:[#allocation8 + $0xd8] sm:$0xff] }
 0x1be   :  { %v798_v11 = vsel %vm790_vm8, %v786_v31, %v794_v39  ;;  %799 = vst.msk [vmem:[#allocation2 + $0x8] sm:$0xff] %vm130_vm0, %v795_v40  ;;  %800 = vst.msk [vmem:[#allocation2 + $0x10] sm:$0xff] %vm130_vm0, %v796_v41  ;;  %v3196_v31 = vpack.c.bf16 %v1162_v29, %v1161_v27  ;;  %v1163_v33 = vld [vmem:[#allocation8 + $0xe0] sm:$0xff]  ;;  %v1164_v34 = vld [vmem:[#allocation8 + $0xe8] sm:$0xff] }
 0x1bf   :  { %801 = vst.msk [vmem:[#allocation2 + $0x28] sm:$0xff] %vm130_vm0, %v797_v13  ;;  %802 = vst.msk [vmem:[#allocation2 + $0x30] sm:$0xff] %vm130_vm0, %v798_v11  ;;  %v3200_v40 = vpack.c.bf16 %v1164_v34, %v1163_v33  ;;  %v1165_v41 = vld [vmem:[#allocation8 + $0xf0] sm:$0xff]  ;;  %v1166_v13 = vld [vmem:[#allocation8 + $0xf8] sm:$0xff] }
 0x1c0   :  { %v3204_v28 = vpack.c.bf16 %v1166_v13, %v1165_v41 }
 0x1c5   :  { %v3908_v42 = vld [vmem:[#allocation2 + $0x8] sm:$0xff]  ;;  %v3910_v43 = vld [vmem:[#allocation2 + $0x10] sm:$0xff] }
 0x1c6   :  { %v3912_v45 = vld [vmem:[#allocation2 + $0x28] sm:$0xff]  ;;  %v836_v46 = vrot.slane %v3908_v42, 7  ;;  %v838_v47 = vrot.slane %v3910_v43, 7  ;;  %v3917_v49 = vld [vmem:[#allocation2 + $0x30] sm:$0xff]  ;;  %v818_v44 = vrot.slane %v3908_v42, 6  ;;  %v820_v2 = vrot.slane %v3910_v43, 6 }
 0x1c7   :  { %v841_v48 = vrot.slane %v3912_v45, 7  ;;  %v843_v52 = vrot.slane %v3917_v49, 7  ;;  %v823_v7 = vrot.slane %v3912_v45, 6  ;;  %v825_v8 = vrot.slane %v3917_v49, 6 }
 0x1c8   :  { %v837_v22 = vsel %vm176_vm2, %v3794_v25, %v836_v46  ;;  %v839_v50 = vsel %vm176_vm2, %v836_v46, %v838_v47  ;;  %v819_v61 = vsel %vm157_vm1, %v158_v18, %v818_v44  ;;  %v821_v18 = vsel %vm157_vm1, %v818_v44, %v820_v2  ;;  %v1276_v46 = vld [vmem:[#allocation8 + $0x108] sm:$0xff] }
 0x1c9   :  { %2816 = vmatprep.mubr.msk.f32.mxu1 %vm130_vm0, %v837_v22  ;;  %v842_v36 = vsel %vm176_vm2, %v3825_v60, %v841_v48  ;;  %v844_v57 = vsel %vm176_vm2, %v841_v48, %v843_v52  ;;  %v824_v12 = vsel %vm157_vm1, %v163_v37, %v823_v7  ;;  %v826_v16 = vsel %vm157_vm1, %v823_v7, %v825_v8  ;;  %v1277_v48 = vld [vmem:[#allocation8 + $0x110] sm:$0xff]  ;;  %v1278_v22 = vld [vmem:[#allocation8 + $0x118] sm:$0xff] }
 0x1ca   :  { %2817 = vmatmul.mubr.msk.f32.vlgmr.msra.gmra.mrb[4].mxu1 %vm130_vm0, %v839_v50  ;;  %v3192_v37 = vpack.c.bf16 %v1160_v24, %v1159_v21  ;;  %v1148_v38 = vrot.slane %v3908_v42, 1  ;;  %v1149_v39 = vrot.slane %v3910_v43, 1  ;;  %v3208_v47 = vpack.c.bf16 %v1276_v46, %v1275_v32 }
 0x1cb   :  { %3163 = vmatpush3.bf16.msra.mxu1 %v3882_v5  ;;  %2819 = vmatprep.mubr.msk.f32.mxu1 %vm130_vm0, %v842_v36  ;;  %v1041_v5 = vld [vmem:[#allocation8 + $0x80] sm:$0xff]  ;;  %v1153_v50 = vrot.slane %v3912_v45, 1  ;;  %v3212_v52 = vpack.c.bf16 %v1278_v22, %v1277_v48  ;;  %v1280_v36 = vld [vmem:[#allocation8 + $0x128] sm:$0xff] }
 0x1cc   :  { %3165 = vmatprep.subr.bf16.mxu1 %v3164_v51  ;;  %v3176_v0 = vpack.c.bf16 %v1042_v63, %v1041_v5  ;;  %v1150_v11 = vsel %vm490_vm3, %v1148_v38, %v1149_v39  ;;  %v1152_v54 = vsel %vm490_vm3, %v1149_v39, %v494_v26  ;;  %v3216_v58 = vpack.c.bf16 %v1280_v36, %v1279_v55  ;;  %v1282_v26 = vld [vmem:[#allocation8 + $0x138] sm:$0xff] }
 0x1cd   :  { %v1270_v5 = vrot.slane %v3917_v49, 2 }
 0x1ce   :  { %2820 = vmatmul.mubr.msk.f32.gmra.mrb[6].mxu1 %vm130_vm0, %v844_v57  ;;  %v1265_v57 = vrot.slane %v3910_v43, 2 }
 0x1cf   :  { %3167 = vmatpush3.bf16.msra.mxu1 %v3164_v51  ;;  %2838 = vmatprep.mubr.msk.f32.mxu1 %vm130_vm0, %v819_v61  ;;  %v1154_v51 = vrot.slane %v3917_v49, 1  ;;  %v1281_v61 = vld [vmem:[#allocation8 + $0x130] sm:$0xff]  ;;  %v1273_v2 = vsel %vm607_vm4, %v1270_v5, %v3874_v53 }
 0x1d0   :  { %3169 = vmatprep.subr.bf16.mxu1 %v3168_v56  ;;  %v1268_v63 = vsel %vm607_vm4, %v1265_v57, %v611_v30  ;;  %v1505_v30 = vld [vmem:[#allocation9 + $0x60] sm:$0xff] }
 0x1d1   :  { %v1155_v44 = vsel %vm490_vm3, %v1153_v50, %v1154_v51  ;;  %v1157_v59 = vsel %vm490_vm3, %v1154_v51, %v3856_v35 }
 0x1d3   :  { %3171 = vmatpush3.bf16.msra.mxu1 %v3168_v56  ;;  %v1264_v56 = vrot.slane %v3908_v42, 2 }
 0x1d4   :  { %3173 = vmatprep.subr.bf16.mxu1 %v3172_v62 }
 0x1d7   :  { %3175 = vmatpush3.bf16.msra.mxu1 %v3172_v62  ;;  %v1266_v62 = vsel %vm607_vm4, %v1264_v56, %v1265_v57 }
 0x1d8   :  { %3177 = vmatprep.subr.bf16.mxu1 %v3176_v0 }
 0x1da   :  { %2839 = vmatmul.mubr.msk.f32.vlgmr.msra.gmra.mrb[4].mxu1 %vm130_vm0, %v821_v18  ;;  %v1507_v18 = vld [vmem:[#allocation9 + $0x70] sm:$0xff] }
 0x1db   :  { %2841 = vmatprep.mubr.msk.f32.mxu1 %vm130_vm0, %v824_v12  ;;  %3179 = vmatpush3.bf16.msra.mxu1 %v3176_v0  ;;  %v3236_v10 = vpack.c.bf16 %v1508_v9, %v1507_v18  ;;  %v1482_v12 = vld [vmem:[#allocation9] sm:$0xff] }
 0x1dc   :  { %3181 = vmatprep.subr.bf16.mxu1 %v3180_v15 }
 0x1de   :  { %2842 = vmatmul.mubr.msk.f32.gmra.mrb[6].mxu1 %vm130_vm0, %v826_v16 }
 0x1df   :  { %3183 = vmatpush3.bf16.msra.mxu1 %v3180_v15  ;;  %2860 = vmatprep.mubr.msk.f32.mxu1 %vm130_vm0, %v3908_v42  ;;  %v3220_v42 = vpack.c.bf16 %v1282_v26, %v1281_v61  ;;  %v1506_v15 = vld [vmem:[#allocation9 + $0x68] sm:$0xff] }
 0x1e0   :  { %3185 = vmatprep.subr.bf16.mxu1 %v3184_v14  ;;  %v3232_v8 = vpack.c.bf16 %v1506_v15, %v1505_v30 }
 0x1e3   :  { %3187 = vmatpush3.bf16.msra.mxu1 %v3184_v14  ;;  %v1483_v14 = vld [vmem:[#allocation9 + $0x8] sm:$0xff] }
 0x1e4   :  { %3189 = vmatprep.subr.bf16.mxu1 %v3188_v23  ;;  %v3985_v16 = vpack.c.bf16 %v1483_v14, %v1482_v12 }
 0x1e7   :  { %3191 = vmatpush3.bf16.msra.mxu1 %v3188_v23 }
 0x1e8   :  { %3193 = vmatprep.subr.bf16.mxu1 %v3192_v37 }
 0x1ea   :  { %2861 = vmatmul.mubr.msk.f32.vlgmr.msra.gmra.mrb[4].mxu1 %vm130_vm0, %v3910_v43  ;;  %v1269_v43 = vrot.slane %v3912_v45, 2 }
 0x1eb   :  { %2863 = vmatprep.mubr.msk.f32.mxu1 %vm130_vm0, %v3912_v45  ;;  %3195 = vmatpush3.bf16.msra.mxu1 %v3192_v37  ;;  %v1502_v45 = vld [vmem:[#allocation9 + $0x48] sm:$0xff] }
 0x1ec   :  { %3197 = vmatprep.subr.bf16.mxu1 %v3196_v31  ;;  %v1271_v0 = vsel %vm607_vm4, %v1269_v43, %v1270_v5  ;;  %v3224_v6 = vpack.c.bf16 %v1502_v45, %v1501_v3  ;;  %v1419_v3 = vld [vmem:[%s4137_s6] sm:$0x1] }
 0x1ee   :  { %2864 = vmatmul.mubr.msk.f32.gmra.mrb[6].mxu1 %vm130_vm0, %v3917_v49  ;;  %3225 = vmatprep.subr.bf16.mxu0 %v3224_v6  ;;  %v1503_v49 = vld [vmem:[#allocation9 + $0x50] sm:$0xff] }
 0x1ef   :  { %3199 = vmatpush3.bf16.msra.mxu1 %v3196_v31  ;;  %2882 = vmatprep.mubr.msk.f32.mxu1 %vm130_vm0, %v1150_v11  ;;  %v3228_v7 = vpack.c.bf16 %v1504_v20, %v1503_v49 }
 0x1f0   :  { %3201 = vmatprep.subr.bf16.mxu1 %v3200_v40  ;;  %3227 = vmatpush3.bf16.msra.mxu0 %v3224_v6 }
 0x1f1   :  { %3229 = vmatprep.subr.bf16.mxu0 %v3228_v7 }
 0x1f3   :  { %3203 = vmatpush3.bf16.msra.mxu1 %v3200_v40 }
 0x1f4   :  { %3205 = vmatprep.subr.bf16.mxu1 %v3204_v28  ;;  %3231 = vmatpush3.bf16.msra.mxu0 %v3228_v7 }
 0x1f5   :  { %3233 = vmatprep.subr.bf16.mxu0 %v3232_v8 }
 0x1f7   :  { %3207 = vmatpush3.bf16.msra.mxu1 %v3204_v28 }
 0x1f8   :  { %3209 = vmatprep.subr.bf16.mxu1 %v3208_v47  ;;  %3235 = vmatpush3.bf16.msra.mxu0 %v3232_v8 }
 0x1f9   :  { %3237 = vmatprep.subr.bf16.mxu0 %v3236_v10 }
 0x1fa   :  { %2883 = vmatmul.mubr.msk.f32.vlgmr.msra.gmra.mrb[4].mxu1 %vm130_vm0, %v1152_v54 }
 0x1fb   :  { %2885 = vmatprep.mubr.msk.f32.mxu1 %vm130_vm0, %v1155_v44  ;;  %3211 = vmatpush3.bf16.msra.mxu1 %v3208_v47 }
 0x1fc   :  { %3213 = vmatprep.subr.bf16.mxu1 %v3212_v52  ;;  %3239 = vmatpush3.bf16.msra.mxu0 %v3236_v10 }
 0x1fd   :  { %3241 = vmatprep.subr.bf16.mxu0 %v3985_v16 }
 0x1fe   :  { %2886 = vmatmul.mubr.msk.f32.gmra.mrb[6].mxu1 %vm130_vm0, %v1157_v59 }
 0x1ff   :  { %3215 = vmatpush3.bf16.msra.mxu1 %v3212_v52  ;;  %2904 = vmatprep.mubr.msk.f32.mxu1 %vm130_vm0, %v1266_v62 }
 0x200   :  { %3217 = vmatprep.subr.bf16.mxu1 %v3216_v58 }
 0x203   :  { %3219 = vmatpush3.bf16.msra.mxu1 %v3216_v58 }
 0x204   :  { %3221 = vmatprep.subr.bf16.mxu1 %v3220_v42 }
 0x207   :  { %3223 = vmatpush3.bf16.msra.mxu1 %v3220_v42 }
 0x20a   :  { %2905 = vmatmul.mubr.msk.f32.vlgmr.msra.gmra.mrb[4].mxu1 %vm130_vm0, %v1268_v63  ;;  %v1415_v63 = vld [vmem:[%s4136_s5] sm:$0x1] }
 0x20b   :  { %2907 = vmatprep.mubr.msk.f32.mxu1 %vm130_vm0, %v1271_v0 }
 0x20e   :  { %2908 = vmatmul.mubr.msk.f32.gmra.mrb[6].mxu1 %vm130_vm0, %v1273_v2 }
 0x2dd   :  { %v2906_v17 = vpop.f32.mrb[4].mxu1 }
 0x2de   :  { %v1381_v19 = vsel %vm130_vm0, %v2906_v17, 0.0  ;;  %v1395_v23 = vmul.f32 %v2906_v17, %v2906_v17  ;;  %v1357_v21 = vpop.f32.mrb[5].mxu1 }
 0x2df   :  { %v1380_v24 = vsel %vm130_vm0, %v1357_v21, 0.0  ;;  %v1394_v37 = vmul.f32 %v1357_v21, %v1357_v21 }
 0x2e0   :  { %v1399_v27 = vsel %vm130_vm0, %v1395_v23, 0.0  ;;  %v1382_v29 = vadd.f32 %v1381_v19, %v1380_v24 }
 0x2e1   :  { %v1398_v31 = vsel %vm130_vm0, %v1394_v37, 0.0  ;;  %v2909_v33 = vpop.f32.mrb[6].mxu1 }
 0x2e2   :  { %v1400_v34 = vadd.f32 %v1399_v27, %v1398_v31  ;;  %v1367_v38 = vpop.f32.mrb[7].mxu1  ;;  %v1397_v39 = vmul.f32 %v2909_v33, %v2909_v33  ;;  %v1385_v11 = vsel %vm130_vm0, %v2909_v33, 0.0  ;;  %v1485_v31 = vld [vmem:[#allocation9 + $0x18] sm:$0xff] }
 0x2e3   :  { %v1383_v40 = vsel %vm130_vm0, %v1367_v38, 0.0  ;;  %v1396_v41 = vmul.f32 %v1367_v38, %v1367_v38 }
 0x2e4   :  { %v1384_v13 = vadd.f32 %v1383_v40, %v1382_v29  ;;  %v1403_v47 = vsel %vm130_vm0, %v1397_v39, 0.0  ;;  %v1484_v29 = vld [vmem:[#allocation9 + $0x10] sm:$0xff] }
 0x2e5   :  { %v1401_v28 = vsel %vm130_vm0, %v1396_v41, 0.0 }
 0x2e6   :  { %v1386_v32 = vadd.f32 %v1385_v11, %v1384_v13  ;;  %v1402_v46 = vadd.f32 %v1401_v28, %v1400_v34 }
 0x2e8   :  { %v1387_v48 = vrot.slane %v1386_v32, 4  ;;  %v1404_v22 = vadd.f32 %v1403_v47, %v1402_v46  ;;  %v1486_v47 = vld [vmem:[#allocation9 + $0x20] sm:$0xff] }
 0x2ea   :  { %v1388_v50 = vadd.f32 %v1387_v48, %v1386_v32  ;;  %v1405_v51 = vrot.slane %v1404_v22, 4  ;;  %v3244_v32 = vpack.c.bf16 %v1485_v31, %v1484_v29  ;;  %v1487_v48 = vld [vmem:[#allocation9 + $0x28] sm:$0xff]  ;;  %v1930_v29 = vld [vmem:[#allocation9 + $0x100] sm:$0xff] }
 0x2eb   :  { %v1931_v31 = vld [vmem:[#allocation9 + $0x108] sm:$0xff] }
 0x2ec   :  { %v1389_v52 = vrot.slane %v1388_v50, 2  ;;  %v1406_v54 = vadd.f32 %v1405_v51, %v1404_v22 }
 0x2ee   :  { %v1390_v55 = vadd.f32 %v1389_v52, %v1388_v50  ;;  %v1407_v36 = vrot.slane %v1406_v54, 2  ;;  %v3416_v50 = vld [vmem:[#allocation2] sm:$0xff] }
 0x2ef   :  { %v1472_v51 = vrot.slane %v3416_v50, 6  ;;  %v1935_v50 = vld [vmem:[#allocation9 + $0x128] sm:$0xff] }
 0x2f0   :  { %v1391_v44 = vrot.slane %v1390_v55, 1  ;;  %v1408_v56 = vadd.f32 %v1407_v36, %v1406_v54  ;;  %v1489_v36 = vld [vmem:[#allocation9 + $0x38] sm:$0xff] }
 0x2f2   :  { %v1392_v57 = vadd.f32 %v1391_v44, %v1390_v55  ;;  %v1409_v58 = vrot.slane %v1408_v56, 1  ;;  %v1488_v55 = vld [vmem:[#allocation9 + $0x30] sm:$0xff] }
 0x2f4   :  { %v1393_v59 = vmul.f32 0.03125, %v1392_v57  ;;  %v1410_v61 = vadd.f32 %v1409_v58, %v1408_v56  ;;  %v1696_v56 = vld [vmem:[#allocation9 + $0x80] sm:$0xff]  ;;  %v1697_v57 = vld [vmem:[#allocation9 + $0x88] sm:$0xff] }
 0x2f6   :  { %v1411_v26 = vmul.f32 0.03125, %v1410_v61  ;;  %v1412_v62 = vmul.f32 %v1393_v59, %v1393_v59  ;;  %v1699_v61 = vld [vmem:[#allocation9 + $0x98] sm:$0xff] }
 0x2f8   :  { %v1413_v42 = vsub.f32 %v1411_v26, %v1412_v62  ;;  %v3417_v26 = vld [vmem:[#allocation2 + $0x20] sm:$0xff] }
 0x2f9   :  { %v1477_v62 = vrot.slane %v3417_v26, 6 }
 0x2fa   :  { %v1414_v43 = vmax.f32 %v1413_v42, 0.0 }
 0x2fc   :  { %v1416_v5 = vadd.f32 1e-05, %v1414_v43 }
 0x2fe   :  { %3396 = vrsqrt.f32 %v1416_v5 }
 0x308   :  { %v3397_v0 = vpop.eup %3396 }
 0x309   :  { %v1418_v2 = vmul.f32 %v3397_v0, %v1415_v63  ;;  %v1700_v0 = vld [vmem:[#allocation9 + $0xa0] sm:$0xff] }
 0x30b   :  { %v1420_v45 = vmul.f32 %v1418_v2, %v1393_v59  ;;  %v1426_v6 = vrot.slane %v1418_v2, %v3897_v4  ;;  %v1698_v59 = vld [vmem:[#allocation9 + $0x90] sm:$0xff]  ;;  %v1701_v2 = vld [vmem:[#allocation9 + $0xa8] sm:$0xff] }
 0x30c   :  { %v3260_v43 = vpack.c.bf16 %v1699_v61, %v1698_v59  ;;  %v2109_v59 = vld [vmem:[#allocation11] sm:$0xff]  ;;  %v2110_v61 = vld [vmem:[#allocation11 + $0x8] sm:$0xff] }
 0x30d   :  { %v1421_v49 = vsub.f32 %v1419_v3, %v1420_v45  ;;  %v1428_v20 = vmul.f32 %v1426_v6, %v1357_v21  ;;  %v1429_v7 = vmul.f32 %v2906_v17, %v1426_v6  ;;  %v1430_v30 = vmul.f32 %v1426_v6, %v1367_v38 }
 0x30e   :  { %v1431_v15 = vmul.f32 %v2909_v33, %v1426_v6  ;;  %v3264_v45 = vpack.c.bf16 %v1701_v2, %v1700_v0  ;;  %v3304_v26 = vpack.c.bf16 %v2110_v61, %v2109_v59  ;;  %v2116_v0 = vld [vmem:[#allocation11 + $0x38] sm:$0xff] }
 0x30f   :  { %v1436_v18 = vrot.slane %v1421_v49, %v3897_v4  ;;  %v1702_v49 = vld [vmem:[#allocation9 + $0xb0] sm:$0xff] }
 0x310   :  { %3305 = vmatprep.subr.bf16.mxu1 %v3304_v26 }
 0x311   :  { %v1438_v8 = vadd.f32 %v1436_v18, %v1428_v20  ;;  %v1439_v9 = vadd.f32 %v1436_v18, %v1429_v7  ;;  %v1440_v10 = vadd.f32 %v1436_v18, %v1430_v30  ;;  %v1441_v12 = vadd.f32 %v1436_v18, %v1431_v15  ;;  %v1703_v20 = vld [vmem:[#allocation9 + $0xb8] sm:$0xff]  ;;  %v1814_v30 = vld [vmem:[#allocation9 + $0xc0] sm:$0xff]  ;;  %v1815_v15 = vld [vmem:[#allocation9 + $0xc8] sm:$0xff]  ;;  %3307 = vmatpush3.bf16.msra.mxu1 %v3304_v26 }
 0x312   :  { %v3268_v7 = vpack.c.bf16 %v1703_v20, %v1702_v49  ;;  %v3272_v18 = vpack.c.bf16 %v1815_v15, %v1814_v30 }
 0x313   :  { %vm1442_vm9 = vcmp.gt.f32.partialorder %v1438_v8, 0.0  ;;  %vm1443_vm10 = vcmp.gt.f32.partialorder %v1439_v9, 0.0  ;;  %vm1444_vm11 = vcmp.gt.f32.partialorder %v1440_v10, 0.0  ;;  %vm1445_vm12 = vcmp.gt.f32.partialorder %v1441_v12, 0.0 }
 0x314   :  { %v1446_v14 = vmul.f32 0.2, %v1438_v8  ;;  %v1447_v19 = vmul.f32 0.2, %v1439_v9  ;;  %v1448_v23 = vmul.f32 0.2, %v1440_v10 }
 0x315   :  { %v1449_v24 = vmul.f32 0.2, %v1441_v12 }
 0x316   :  { %v1450_v37 = vsel %vm1442_vm9, %v1438_v8, %v1446_v14  ;;  %v1451_v27 = vsel %vm1443_vm10, %v1439_v9, %v1447_v19  ;;  %v1452_v21 = vsel %vm1444_vm11, %v1440_v10, %v1448_v23  ;;  %v1816_v8 = vld [vmem:[#allocation9 + $0xd0] sm:$0xff]  ;;  %v1817_v9 = vld [vmem:[#allocation9 + $0xd8] sm:$0xff]  ;;  %v1819_v14 = vld [vmem:[#allocation9 + $0xe8] sm:$0xff] }
 0x317   :  { %v1453_v17 = vsel %vm1445_vm12, %v1441_v12, %v1449_v24  ;;  %1454 = vst.msk [vmem:[#allocation2 + $0x8] sm:$0xff] %vm130_vm0, %v1450_v37  ;;  %1455 = vst.msk [vmem:[#allocation2 + $0x10] sm:$0xff] %vm130_vm0, %v1451_v27  ;;  %v3276_v10 = vpack.c.bf16 %v1817_v9, %v1816_v8  ;;  %v1818_v12 = vld [vmem:[#allocation9 + $0xe0] sm:$0xff]  ;;  %v1820_v37 = vld [vmem:[#allocation9 + $0xf0] sm:$0xff] }
 0x318   :  { %1456 = vst.msk [vmem:[#allocation2 + $0x28] sm:$0xff] %vm130_vm0, %v1452_v21  ;;  %1457 = vst.msk [vmem:[#allocation2 + $0x30] sm:$0xff] %vm130_vm0, %v1453_v17  ;;  %v3280_v24 = vpack.c.bf16 %v1819_v14, %v1818_v12  ;;  %v1821_v27 = vld [vmem:[#allocation9 + $0xf8] sm:$0xff] }
 0x319   :  { %v3284_v17 = vpack.c.bf16 %v1821_v27, %v1820_v37 }
 0x31e   :  { %v4008_v33 = vld [vmem:[#allocation2 + $0x8] sm:$0xff]  ;;  %v4010_v34 = vld [vmem:[#allocation2 + $0x10] sm:$0xff] }
 0x31f   :  { %v4012_v38 = vld [vmem:[#allocation2 + $0x28] sm:$0xff]  ;;  %v1491_v39 = vrot.slane %v4008_v33, 7  ;;  %v1493_v40 = vrot.slane %v4010_v34, 7  ;;  %v4017_v13 = vld [vmem:[#allocation2 + $0x30] sm:$0xff]  ;;  %v1473_v52 = vrot.slane %v4008_v33, 6  ;;  %v1475_v58 = vrot.slane %v4010_v34, 6 }
 0x320   :  { %v1496_v41 = vrot.slane %v4012_v38, 7  ;;  %v1498_v46 = vrot.slane %v4017_v13, 7  ;;  %v1478_v42 = vrot.slane %v4012_v38, 6  ;;  %v1480_v63 = vrot.slane %v4017_v13, 6 }
 0x321   :  { %v1492_v11 = vsel %vm176_vm2, %v3794_v25, %v1491_v39  ;;  %v1494_v28 = vsel %vm176_vm2, %v1491_v39, %v1493_v40  ;;  %v3248_v25 = vpack.c.bf16 %v1487_v48, %v1486_v47  ;;  %v1474_v44 = vsel %vm157_vm1, %v1472_v51, %v1473_v52  ;;  %v1461_v39 = vld [vmem:[#allocation2 + $0x18] sm:$0xff] }
 0x322   :  { %2926 = vmatprep.mubr.msk.f32.mxu0 %vm130_vm0, %v1492_v11  ;;  %v1497_v22 = vsel %vm176_vm2, %v3825_v60, %v1496_v41  ;;  %v1499_v54 = vsel %vm176_vm2, %v1496_v41, %v1498_v46  ;;  %v3252_v60 = vpack.c.bf16 %v1489_v36, %v1488_v55  ;;  %v1476_v5 = vsel %vm157_vm1, %v1473_v52, %v1475_v58  ;;  %v1932_v11 = vld [vmem:[#allocation9 + $0x110] sm:$0xff] }
 0x323   :  { %2927 = vmatmul.mubr.msk.f32.vlgmr.msra.gmra.mrb[4].mxu0 %vm130_vm0, %v1494_v28  ;;  %v1479_v3 = vsel %vm157_vm1, %v1477_v62, %v1478_v42  ;;  %v1481_v6 = vsel %vm157_vm1, %v1478_v42, %v1480_v63  ;;  %v1803_v19 = vrot.slane %v4008_v33, 1  ;;  %v1804_v23 = vrot.slane %v4010_v34, 1  ;;  %v1933_v28 = vld [vmem:[#allocation9 + $0x118] sm:$0xff]  ;;  %v1936_v36 = vld [vmem:[#allocation9 + $0x130] sm:$0xff]  ;;  %v2113_v42 = vld [vmem:[#allocation11 + $0x20] sm:$0xff] }
 0x324   :  { %3243 = vmatpush3.bf16.msra.mxu0 %v3985_v16  ;;  %2929 = vmatprep.mubr.msk.f32.mxu0 %vm130_vm0, %v1497_v22  ;;  %v3256_v16 = vpack.c.bf16 %v1697_v57, %v1696_v56  ;;  %v3288_v40 = vpack.c.bf16 %v1931_v31, %v1930_v29  ;;  %v1806_v41 = vrot.slane %v1461_v39, 1  ;;  %v1809_v46 = vrot.slane %v4017_v13, 1  ;;  %v1934_v22 = vld [vmem:[#allocation9 + $0x120] sm:$0xff]  ;;  %v2115_v63 = vld [vmem:[#allocation11 + $0x30] sm:$0xff] }
 0x325   :  { %3245 = vmatprep.subr.bf16.mxu0 %v3244_v32  ;;  %v1805_v21 = vsel %vm490_vm3, %v1803_v19, %v1804_v23  ;;  %v3292_v47 = vpack.c.bf16 %v1933_v28, %v1932_v11  ;;  %v1919_v52 = vrot.slane %v4008_v33, 2  ;;  %v1924_v56 = vrot.slane %v4012_v38, 2 }
 0x326   :  { %v1807_v48 = vsel %vm490_vm3, %v1804_v23, %v1806_v41  ;;  %v1812_v55 = vsel %vm490_vm3, %v1809_v46, %v3856_v35  ;;  %v1925_v57 = vrot.slane %v4017_v13, 2  ;;  %v3316_v2 = vpack.c.bf16 %v2116_v0, %v2115_v63  ;;  %v2235_v63 = vld [vmem:[#allocation12 + $0x10] sm:$0xff]  ;;  %v2236_v0 = vld [vmem:[#allocation12 + $0x18] sm:$0xff] }
 0x327   :  { %2930 = vmatmul.mubr.msk.f32.gmra.mrb[6].mxu0 %vm130_vm0, %v1499_v54  ;;  %v3296_v54 = vpack.c.bf16 %v1935_v50, %v1934_v22 }
 0x328   :  { %3247 = vmatpush3.bf16.msra.mxu0 %v3244_v32  ;;  %2948 = vmatprep.mubr.msk.f32.mxu0 %vm130_vm0, %v1474_v44  ;;  %v1808_v32 = vrot.slane %v4012_v38, 1  ;;  %v1937_v44 = vld [vmem:[#allocation9 + $0x138] sm:$0xff]  ;;  %v1928_v58 = vsel %vm607_vm4, %v1925_v57, %v3874_v53  ;;  %v2233_v53 = vld [vmem:[#allocation12] sm:$0xff] }
 0x329   :  { %3249 = vmatprep.subr.bf16.mxu0 %v3248_v25 }
 0x32a   :  { %v1810_v51 = vsel %vm490_vm3, %v1808_v32, %v1809_v46 }
 0x32c   :  { %3251 = vmatpush3.bf16.msra.mxu0 %v3248_v25  ;;  %v1920_v25 = vrot.slane %v4010_v34, 2 }
 0x32d   :  { %3253 = vmatprep.subr.bf16.mxu0 %v3252_v60 }
 0x330   :  { %3255 = vmatpush3.bf16.msra.mxu0 %v3252_v60  ;;  %v1921_v60 = vsel %vm607_vm4, %v1919_v52, %v1920_v25 }
 0x331   :  { %3257 = vmatprep.subr.bf16.mxu0 %v3256_v16 }
 0x333   :  { %2949 = vmatmul.mubr.msk.f32.vlgmr.msra.gmra.mrb[4].mxu0 %vm130_vm0, %v1476_v5 }
 0x334   :  { %2951 = vmatprep.mubr.msk.f32.mxu0 %vm130_vm0, %v1479_v3  ;;  %3259 = vmatpush3.bf16.msra.mxu0 %v3256_v16  ;;  %v1926_v16 = vsel %vm607_vm4, %v1924_v56, %v1925_v57  ;;  %v2234_v3 = vld [vmem:[#allocation12 + $0x8] sm:$0xff]  ;;  %v2074_v57 = vld [vmem:[%s4140_s9] sm:$0x1] }
 0x335   :  { %3261 = vmatprep.subr.bf16.mxu0 %v3260_v43 }
 0x337   :  { %2952 = vmatmul.mubr.msk.f32.gmra.mrb[6].mxu0 %vm130_vm0, %v1481_v6 }
 0x338   :  { %3263 = vmatpush3.bf16.msra.mxu0 %v3260_v43  ;;  %2970 = vmatprep.mubr.msk.f32.mxu0 %vm130_vm0, %v4008_v33  ;;  %v3300_v33 = vpack.c.bf16 %v1937_v44, %v1936_v36  ;;  %v2114_v43 = vld [vmem:[#allocation11 + $0x28] sm:$0xff] }
 0x339   :  { %3265 = vmatprep.subr.bf16.mxu0 %v3264_v45  ;;  %v3312_v5 = vpack.c.bf16 %v2114_v43, %v2113_v42 }
 0x33c   :  { %3267 = vmatpush3.bf16.msra.mxu0 %v3264_v45  ;;  %v4077_v45 = vpack.c.bf16 %v2234_v3, %v2233_v53 }
 0x33d   :  { %3269 = vmatprep.subr.bf16.mxu0 %v3268_v7 }
 0x340   :  { %3271 = vmatpush3.bf16.msra.mxu0 %v3268_v7 }
 0x341   :  { %3273 = vmatprep.subr.bf16.mxu0 %v3272_v18 }
 0x343   :  { %2971 = vmatmul.mubr.msk.f32.vlgmr.msra.gmra.mrb[4].mxu0 %vm130_vm0, %v4010_v34  ;;  %v1922_v34 = vrot.slane %v1461_v39, 2 }
 0x344   :  { %2973 = vmatprep.mubr.msk.f32.mxu0 %vm130_vm0, %v4012_v38  ;;  %3275 = vmatpush3.bf16.msra.mxu0 %v3272_v18  ;;  %v2111_v38 = vld [vmem:[#allocation11 + $0x10] sm:$0xff] }
 0x345   :  { %3277 = vmatprep.subr.bf16.mxu0 %v3276_v10  ;;  %v1923_v35 = vsel %vm607_vm4, %v1920_v25, %v1922_v34 }
 0x347   :  { %2974 = vmatmul.mubr.msk.f32.gmra.mrb[6].mxu0 %vm130_vm0, %v4017_v13  ;;  %v2112_v13 = vld [vmem:[#allocation11 + $0x18] sm:$0xff] }
 0x348   :  { %3279 = vmatpush3.bf16.msra.mxu0 %v3276_v10  ;;  %2992 = vmatprep.mubr.msk.f32.mxu0 %vm130_vm0, %v1805_v21  ;;  %v3308_v62 = vpack.c.bf16 %v2112_v13, %v2111_v38 }
 0x349   :  { %3281 = vmatprep.subr.bf16.mxu0 %v3280_v24 }
 0x34a   :  { %3309 = vmatprep.subr.bf16.mxu1 %v3308_v62 }
 0x34b   :  { %3311 = vmatpush3.bf16.msra.mxu1 %v3308_v62 }
 0x34c   :  { %3283 = vmatpush3.bf16.msra.mxu0 %v3280_v24  ;;  %3313 = vmatprep.subr.bf16.mxu1 %v3312_v5 }
 0x34d   :  { %3285 = vmatprep.subr.bf16.mxu0 %v3284_v17 }
 0x34f   :  { %3315 = vmatpush3.bf16.msra.mxu1 %v3312_v5 }
 0x350   :  { %3287 = vmatpush3.bf16.msra.mxu0 %v3284_v17  ;;  %3317 = vmatprep.subr.bf16.mxu1 %v3316_v2 }
 0x351   :  { %3289 = vmatprep.subr.bf16.mxu0 %v3288_v40 }
 0x353   :  { %2993 = vmatmul.mubr.msk.f32.vlgmr.msra.gmra.mrb[4].mxu0 %vm130_vm0, %v1807_v48  ;;  %3319 = vmatpush3.bf16.msra.mxu1 %v3316_v2 }
 0x354   :  { %2995 = vmatprep.mubr.msk.f32.mxu0 %vm130_vm0, %v1810_v51  ;;  %3291 = vmatpush3.bf16.msra.mxu0 %v3288_v40 }
 0x355   :  { %3293 = vmatprep.subr.bf16.mxu0 %v3292_v47  ;;  %3321 = vmatprep.subr.bf16.mxu1 %v4077_v45 }
 0x357   :  { %2996 = vmatmul.mubr.msk.f32.gmra.mrb[6].mxu0 %vm130_vm0, %v1812_v55 }
 0x358   :  { %3295 = vmatpush3.bf16.msra.mxu0 %v3292_v47  ;;  %3014 = vmatprep.mubr.msk.f32.mxu0 %vm130_vm0, %v1921_v60 }
 0x359   :  { %3297 = vmatprep.subr.bf16.mxu0 %v3296_v54 }
 0x35c   :  { %3299 = vmatpush3.bf16.msra.mxu0 %v3296_v54 }
 0x35d   :  { %3301 = vmatprep.subr.bf16.mxu0 %v3300_v33 }
 0x360   :  { %3303 = vmatpush3.bf16.msra.mxu0 %v3300_v33  ;;  %v2070_v33 = vld [vmem:[%s4139_s8] sm:$0x1] }
 0x363   :  { %3015 = vmatmul.mubr.msk.f32.vlgmr.msra.gmra.mrb[4].mxu0 %vm130_vm0, %v1923_v35 }
 0x364   :  { %3017 = vmatprep.mubr.msk.f32.mxu0 %vm130_vm0, %v1926_v16 }
 0x367   :  { %3018 = vmatmul.mubr.msk.f32.gmra.mrb[6].mxu0 %vm130_vm0, %v1928_v58 }
 0x436   :  { %v3016_v6 = vpop.f32.mrb[4].mxu0 }
 0x437   :  { %v2036_v49 = vsel %vm130_vm0, %v3016_v6, 0.0  ;;  %v2050_v20 = vmul.f32 %v3016_v6, %v3016_v6  ;;  %v2012_v7 = vpop.f32.mrb[5].mxu0 }
 0x438   :  { %v2035_v30 = vsel %vm130_vm0, %v2012_v7, 0.0  ;;  %v2049_v15 = vmul.f32 %v2012_v7, %v2012_v7 }
 0x439   :  { %v2054_v18 = vsel %vm130_vm0, %v2050_v20, 0.0  ;;  %v2037_v8 = vadd.f32 %v2036_v49, %v2035_v30  ;;  %v3324_v30 = vpack.c.bf16 %v2236_v0, %v2235_v63  ;;  %v2346_v0 = vand.u32 127, %v768_v1 }
 0x43a   :  { %v2053_v9 = vsel %vm130_vm0, %v2049_v15, 0.0  ;;  %v3019_v10 = vpop.f32.mrb[6].mxu0  ;;  %v2237_v15 = vld [vmem:[#allocation12 + $0x20] sm:$0xff] }
 0x43b   :  { %v2055_v12 = vadd.f32 %v2054_v18, %v2053_v9  ;;  %v2022_v14 = vpop.f32.mrb[7].mxu0  ;;  %v2052_v19 = vmul.f32 %v3019_v10, %v3019_v10  ;;  %v2040_v27 = vsel %vm130_vm0, %v3019_v10, 0.0  ;;  %v2238_v18 = vld [vmem:[#allocation12 + $0x28] sm:$0xff]  ;;  %v2239_v9 = vld [vmem:[#allocation12 + $0x30] sm:$0xff] }
 0x43c   :  { %v2038_v23 = vsel %vm130_vm0, %v2022_v14, 0.0  ;;  %v2051_v24 = vmul.f32 %v2022_v14, %v2022_v14 }
 0x43d   :  { %v2039_v37 = vadd.f32 %v2038_v23, %v2037_v8  ;;  %v2058_v31 = vsel %vm130_vm0, %v2052_v19, 0.0  ;;  %v3328_v8 = vpack.c.bf16 %v2238_v18, %v2237_v15 }
 0x43e   :  { %v2056_v21 = vsel %vm130_vm0, %v2051_v24, 0.0 }
 0x43f   :  { %v2041_v17 = vadd.f32 %v2040_v27, %v2039_v37  ;;  %v2057_v29 = vadd.f32 %v2056_v21, %v2055_v12 }
 0x441   :  { %v2042_v39 = vrot.slane %v2041_v17, 4  ;;  %v2059_v40 = vadd.f32 %v2058_v31, %v2057_v29 }
 0x443   :  { %v2043_v41 = vadd.f32 %v2042_v39, %v2041_v17  ;;  %v2060_v11 = vrot.slane %v2059_v40, 4 }
 0x445   :  { %v2044_v28 = vrot.slane %v2043_v41, 2  ;;  %v2061_v32 = vadd.f32 %v2060_v11, %v2059_v40 }
 0x447   :  { %v2045_v46 = vadd.f32 %v2044_v28, %v2043_v41  ;;  %v2062_v47 = vrot.slane %v2061_v32, 2 }
 0x449   :  { %v2046_v48 = vrot.slane %v2045_v46, 1  ;;  %v2063_v22 = vadd.f32 %v2062_v47, %v2061_v32 }
 0x44b   :  { %v2047_v50 = vadd.f32 %v2046_v48, %v2045_v46  ;;  %v2064_v51 = vrot.slane %v2063_v22, 1  ;;  %v2481_v46 = vld [vmem:[%s4144_s13] ss:$0 sm:$0xff]  ;;  %s3591_s13 = smov [#allocation14]  }
 0x44c   :  { %s2401_s15 = sshll.u32 %s3591_s13, 4  ;;  %s2402_s15 = int_to_ptr.vmem [resolvable:$true] %s2401_s15 }
 0x44d   :  { %v2048_v52 = vmul.f32 0.03125, %v2047_v50  ;;  %v2065_v25 = vadd.f32 %v2064_v51, %v2063_v22  ;;  %s3550_s17 = scalar_lea.vmem %s2402_s15, 512  ;;  %p3555_p7 = scmp.lt.s32.totalorder %s2402_s15, %s2402_s15 }
 0x44e   :  { %p3551_p6 = scmp.ne.s32.totalorder %s2402_s15, %s3550_s17  ;;  %p3556_p8 = scmp.lt.s32.totalorder %s3550_s17, %s3550_s17 }
 0x44f   :  { %v2066_v54 = vmul.f32 0.03125, %v2065_v25  ;;  %v2067_v55 = vmul.f32 %v2048_v52, %v2048_v52 }
 0x450   :  { %p3557_p9 = por %p3556_p8, %p3555_p7 }
 0x451   :  { %v2068_v36 = vsub.f32 %v2066_v54, %v2067_v55 }
 0x452   :  { %p3558_p10 = pnand %p3557_p9, %p3551_p6 }
 0x453   :  { %v2069_v44 = vmax.f32 %v2068_v36, 0.0 }
 0x455   :  { %v2071_v60 = vadd.f32 1e-05, %v2069_v44 }
 0x457   :  { %3398 = vrsqrt.f32 %v2071_v60 }
 0x461   :  { %v3399_v34 = vpop.eup %3398 }
 0x462   :  { %v2073_v56 = vmul.f32 %v3399_v34, %v2070_v33 }
 0x464   :  { %v2075_v35 = vmul.f32 %v2073_v56, %v2048_v52  ;;  %v2081_v16 = vrot.slane %v2073_v56, %v3897_v4 }
 0x466   :  { %v2076_v58 = vsub.f32 %v2074_v57, %v2075_v35  ;;  %v2085_v59 = vmul.f32 %v2081_v16, %v2022_v14  ;;  %v2083_v61 = vmul.f32 %v2081_v16, %v2012_v7  ;;  %v2084_v26 = vmul.f32 %v3016_v6, %v2081_v16  ;;  %v2476_v14 = vld [vmem:[%s4142_s11] ss:$0 sm:$0xff] }
 0x467   :  { %v2086_v38 = vmul.f32 %v3019_v10, %v2081_v16  ;;  %v2240_v10 = vld [vmem:[#allocation12 + $0x38] sm:$0xff] }
 0x468   :  { %v2091_v13 = vrot.slane %v2076_v58, %v3897_v4  ;;  %v3332_v12 = vpack.c.bf16 %v2240_v10, %v2239_v9 }
 0x46a   :  { %v2095_v62 = vadd.f32 %v2091_v13, %v2085_v59  ;;  %v2093_v42 = vadd.f32 %v2091_v13, %v2083_v61  ;;  %v2094_v43 = vadd.f32 %v2091_v13, %v2084_v26  ;;  %v2096_v5 = vadd.f32 %v2091_v13, %v2086_v38 }
 0x46c   :  { %vm2097_vm13 = vcmp.gt.f32.partialorder %v2093_v42, 0.0  ;;  %v2101_v2 = vmul.f32 0.2, %v2093_v42  ;;  %vm2098_vm14 = vcmp.gt.f32.partialorder %v2094_v43, 0.0  ;;  %v2102_v53 = vmul.f32 0.2, %v2094_v43 }
 0x46d   :  { %vm2099_vm15 = vcmp.gt.f32.partialorder %v2095_v62, 0.0  ;;  %v2103_v3 = vmul.f32 0.2, %v2095_v62  ;;  %v2104_v6 = vmul.f32 0.2, %v2096_v5  ;;  %vm2100_vm1 = vcmp.gt.f32.partialorder %v2096_v5, 0.0 }
 0x46e   :  { %v2105_v49 = vsel %vm2097_vm13, %v2093_v42, %v2101_v2  ;;  %v2106_v20 = vsel %vm2098_vm14, %v2094_v43, %v2102_v53 }
 0x46f   :  { %3036 = vmatprep.mubr.msk.f32.mxu1 %vm130_vm0, %v2105_v49  ;;  %v2107_v4 = vsel %vm2099_vm15, %v2095_v62, %v2103_v3  ;;  %v2108_v7 = vsel %vm2100_vm1, %v2096_v5, %v2104_v6 }
 0x470   :  { %3037 = vmatmul.mubr.msk.f32.vlgmr.msra.gmra.mrb[8].mxu1 %vm130_vm0, %v2106_v20 }
 0x471   :  { %3039 = vmatprep.mubr.msk.f32.mxu1 %vm130_vm0, %v2107_v4  ;;  %3323 = vmatpush3.bf16.msra.mxu1 %v4077_v45 }
 0x472   :  { %3325 = vmatprep.subr.bf16.mxu1 %v3324_v30 }
 0x474   :  { %3040 = vmatmul.mubr.msk.f32.gmra.mrb[10].mxu1 %vm130_vm0, %v2108_v7 }
 0x475   :  { %3327 = vmatpush3.bf16.msra.mxu1 %v3324_v30 }
 0x476   :  { %3329 = vmatprep.subr.bf16.mxu1 %v3328_v8 }
 0x479   :  { %3331 = vmatpush3.bf16.msra.mxu1 %v3328_v8 }
 0x47a   :  { %3333 = vmatprep.subr.bf16.mxu1 %v3332_v12 }
 0x47d   :  { %3335 = vmatpush3.bf16.msra.mxu1 %v3332_v12 }
 0x543   :  { %v3038_v45 = vpop.f32.mrb[8].mxu1 }
 0x544   :  { %v2208_v19 = vadd.f32 %v3038_v45, %v2476_v14  ;;  %v2202_v23 = vpop.f32.mrb[9].mxu1 }
 0x545   :  { %v2203_v24 = vadd.f32 %v2476_v14, %v2202_v23 }
 0x546   :  { %v2226_v37 = vmul.f32 0.2, %v2208_v19  ;;  %vm2222_vm2 = vcmp.gt.f32.partialorder %v2208_v19, 0.0 }
 0x547   :  { %vm2221_vm3 = vcmp.gt.f32.partialorder %v2203_v24, 0.0  ;;  %v2225_v27 = vmul.f32 0.2, %v2203_v24  ;;  %v3041_v21 = vpop.f32.mrb[10].mxu1 }
 0x548   :  { %v2218_v17 = vadd.f32 %v3041_v21, %v2476_v14  ;;  %v2212_v29 = vpop.f32.mrb[11].mxu1  ;;  %v2230_v40 = vsel %vm2222_vm2, %v2208_v19, %v2226_v37 }
 0x549   :  { %v2213_v31 = vadd.f32 %v2476_v14, %v2212_v29  ;;  %v2229_v39 = vsel %vm2221_vm3, %v2203_v24, %v2225_v27 }
 0x54a   :  { %v2228_v41 = vmul.f32 0.2, %v2218_v17  ;;  %3058 = vmatprep.mubr.msk.f32.mxu1 %vm130_vm0, %v2229_v39  ;;  %vm2224_vm4 = vcmp.gt.f32.partialorder %v2218_v17, 0.0 }
 0x54b   :  { %vm2223_vm5 = vcmp.gt.f32.partialorder %v2213_v31, 0.0  ;;  %v2227_v11 = vmul.f32 0.2, %v2213_v31  ;;  %3059 = vmatmul.mubr.msk.f32.vlgmr.msra.gmra.mrb[12].mxu1 %vm130_vm0, %v2230_v40 }
 0x54c   :  { %v2232_v32 = vsel %vm2224_vm4, %v2218_v17, %v2228_v41 }
 0x54d   :  { %v2231_v28 = vsel %vm2223_vm5, %v2213_v31, %v2227_v11 }
 0x54e   :  { %3061 = vmatprep.mubr.msk.f32.mxu1 %vm130_vm0, %v2231_v28 }
 0x54f   :  { %3062 = vmatmul.mubr.msk.f32.gmra.mrb[14].mxu1 %vm130_vm0, %v2232_v32  ;;  %vm2347_vm0 = vcmp.lt.s32.totalorder %v2346_v0, 32 }
 0x61e   :  { %v3060_v47 = vpop.f32.mrb[12].mxu1 }
 0x61f   :  { %v2332_v48 = vadd.f32 %v3060_v47, %v2481_v46  ;;  %v2326_v22 = vpop.f32.mrb[13].mxu1 }
 0x620   :  { %v2327_v50 = vadd.f32 %v2481_v46, %v2326_v22 }
 0x621   :  { %v2353_v51 = vand.u32 2147483647, %v2332_v48  ;;  %v2349_v53 = vmax.f32 %v2332_v48, 0.0 }
 0x622   :  { %v2352_v52 = vand.u32 2147483647, %v2327_v50  ;;  %v3063_v25 = vpop.f32.mrb[14].mxu1  ;;  %v2348_v49 = vmax.f32 %v2327_v50, 0.0 }
 0x623   :  { %v2357_v54 = vsub.f32 0.0, %v2353_v51  ;;  %v2342_v55 = vadd.f32 %v3063_v25, %v2481_v46  ;;  %v2336_v36 = vpop.f32.mrb[15].mxu1 }
 0x624   :  { %v2356_v44 = vsub.f32 0.0, %v2352_v52  ;;  %v2337_v60 = vadd.f32 %v2481_v46, %v2336_v36 }
 0x625   :  { %v2362_v33 = vmul.f32 1.442695, %v2357_v54  ;;  %v2355_v34 = vand.u32 2147483647, %v2342_v55  ;;  %v2351_v18 = vmax.f32 %v2342_v55, 0.0 }
 0x626   :  { %v2360_v56 = vmul.f32 1.442695, %v2356_v44  ;;  %v2354_v57 = vand.u32 2147483647, %v2337_v60  ;;  %v2350_v10 = vmax.f32 %v2337_v60, 0.0 }
 0x627   :  { %3400 = vpow2.f32 %v2362_v33  ;;  %v2359_v35 = vsub.f32 0.0, %v2355_v34 }
 0x628   :  { %3402 = vpow2.f32 %v2360_v56  ;;  %v2358_v16 = vsub.f32 0.0, %v2354_v57 }
 0x629   :  { %v2366_v58 = vmul.f32 1.442695, %v2359_v35 }
 0x62a   :  { %v2364_v59 = vmul.f32 1.442695, %v2358_v16 }
 0x62b   :  { %3404 = vpow2.f32 %v2366_v58 }
 0x62c   :  { %3406 = vpow2.f32 %v2364_v59 }
 0x631   :  { %v3401_v61 = vpop.eup %3400 }
 0x632   :  { %v3403_v26 = vpop.eup %3402  ;;  %v2369_v38 = vadd.f32 1.0, %v3401_v61 }
 0x633   :  { %v2368_v13 = vadd.f32 1.0, %v3403_v26 }
 0x634   :  { %3408 = vlog2.f32 %v2369_v38 }
 0x635   :  { %v3405_v62 = vpop.eup %3404  ;;  %3410 = vlog2.f32 %v2368_v13 }
 0x636   :  { %v3407_v42 = vpop.eup %3406  ;;  %v2371_v43 = vadd.f32 1.0, %v3405_v62 }
 0x637   :  { %v2370_v5 = vadd.f32 1.0, %v3407_v42 }
 0x638   :  { %3412 = vlog2.f32 %v2371_v43 }
 0x639   :  { %3414 = vlog2.f32 %v2370_v5 }
 0x63e   :  { %v3409_v63 = vpop.eup %3408 }
 0x63f   :  { %v3411_v2 = vpop.eup %3410  ;;  %v2375_v3 = vmul.f32 0.6931472, %v3409_v63 }
 0x640   :  { %v2373_v20 = vmul.f32 0.6931472, %v3411_v2 }
 0x641   :  { %v2381_v30 = vadd.f32 %v2375_v3, %v2349_v53 }
 0x642   :  { %v3413_v6 = vpop.eup %3412  ;;  %v2380_v4 = vadd.f32 %v2373_v20, %v2348_v49 }
 0x643   :  { %v3415_v7 = vpop.eup %3414  ;;  %v2385_v15 = vadd.f32 0.0001, %v2381_v30  ;;  %v2379_v8 = vmul.f32 0.6931472, %v3413_v6 }
 0x644   :  { %v2384_v9 = vadd.f32 0.0001, %v2380_v4  ;;  %v2377_v12 = vmul.f32 0.6931472, %v3415_v7 }
 0x645   :  { %v2389_v14 = vsel %vm2347_vm0, %v2332_v48, %v2385_v15  ;;  %v2383_v45 = vadd.f32 %v2379_v8, %v2351_v18 }
 0x646   :  { %2393 = vst [vmem:[#allocation14 + $0x8] sm:$0xff] %v2389_v14  ;;  %v2388_v1 = vsel %vm2347_vm0, %v2327_v50, %v2384_v9  ;;  %v2382_v19 = vadd.f32 %v2377_v12, %v2350_v10 }
 0x647   :  { %2392 = vst [vmem:[#allocation14] sm:$0xff] %v2388_v1  ;;  %v2387_v23 = vadd.f32 0.0001, %v2383_v45 }
 0x648   :  { %v2386_v24 = vadd.f32 0.0001, %v2382_v19 }
 0x649   :  { %v2391_v37 = vsel %vm2347_vm0, %v2342_v55, %v2387_v23 }
 0x64a   :  { %2395 = vst [vmem:[#allocation14 + $0x18] sm:$0xff] %v2391_v37  ;;  %v2390_v27 = vsel %vm2347_vm0, %v2337_v60, %v2386_v24 }
 0x64b   :  { %2394 = vst [vmem:[#allocation14 + $0x10] sm:$0xff] %v2390_v27 }
 0x64c   :  { %3561 = shalt.err (!%p3558_p10)
}
 0x64d   :  { %s3562_s24 = scalar_lea.hbm %s4145_s14, 512 }
 0x64e   :  { %p3563_p11 = scmp.ne.s32.totalorder %s4145_s14, %s3562_s24  ;;  %p3566_p12 = scmp.lt.u32.totalorder %s3562_s24, %s4145_s14 }
 0x650   :  { %p3568_p13 = pnand %p3566_p12, %p3563_p11 }
 0x652   :  { %3571 = shalt.err (!%p3568_p13)
}
 0x653   :  { %2407 = dma.vmem_to_hbm [thread:$0]  %s2402_s15, 512, %s4145_s14, [#allocation5], %s3584_s25, %s3584_s25, %s3585_s26  }
 0x654   :  { %3580 = dma.done.wait [#allocation5], 512  }
 0x655   :  { %3581 = vsyncadd [#allocation5], 4294966784 }
 0x656   :  { %2411 = vsyncpa [#allocation4], 1 }
 0x657   :  { %2412 = vsyncpa [#allocation7], 1 }
 0x658   :  { %2413 = vsyncpa [#allocation10], 1 }
 0x659   :  { %2414 = vsyncpa [#allocation13], 1 }
 0x65a   :  { %2415 = vsyncpa [#allocation5], 1 }

</bundles_post_ra>
